<compile_context>
chip_gen: v7x
topology: tpu7x:2x2x1
jax: 0.10.0
libtpu: 0.0.40
codegen_flags: <defaults>
</compile_context>

<pallas_src>
import functools

import jax
import jax.numpy as jnp
from jax.experimental import pallas as pl
from jax.experimental.pallas import tpu as pltpu

_HIGHEST = jax.lax.Precision.HIGHEST   # offline weight folding / reference only


def mynet_kernel(feat_ref, label_ref, fk_ref, tp_ref, fs_ref, ft_ref,
                 wbig_ref, bbig_ref, nlab_ref, m_ref, coef_ref, out_ref,
                 *, h_dim, e_dim):
    f32 = jnp.float32
    sig = jax.nn.sigmoid
    H, E = h_dim, e_dim
    K = fk_ref.shape[0]
    P = tp_ref.shape[0]
    Q = fs_ref.shape[0]

    # [x | x^T W2 | x U^T | x^T W2 U^T] in one (TB, 768) @ (768, 2H+2E) matmul.
    xall = jnp.dot(feat_ref[...], wbig_ref[...],
                   preferred_element_type=f32) + bbig_ref[...]
    xvec = xall[:, 0:H]                       # x
    xw2 = xall[:, H:2 * H]                    # x^T W2
    vx = xall[:, 2 * H:2 * H + E]             # (U x)^T
    vxu = xall[:, 2 * H + E:2 * H + 2 * E]    # x^T W2 U^T

    # [U1 | v1] = label @ [U | U (U W1)^T] in one (TB, E) @ (E, H+E) matmul.
    uv = jnp.dot(label_ref[...], nlab_ref[...], preferred_element_type=f32)
    u1 = uv[:, 0:H]
    v1 = uv[:, H:H + E]

    p1 = sig(jnp.sum(u1 * xvec, axis=-1, keepdims=True))            # (TB, 1)
    c3 = jnp.sum(u1 * xw2, axis=-1, keepdims=True)                  # (TB, 1)

    # ---- false_k group: p2, p5 (pure VPU/XLU/EUP, no MXU) ----
    p2 = jnp.zeros_like(p1)
    p5 = jnp.zeros_like(p1)
    for k in range(K):
        fk = fk_ref[k].astype(f32)                                   # (TB, E)
        dk = jnp.sum(fk * vx, axis=-1, keepdims=True)                # <U2, x>
        sk = jnp.sum(fk * v1, axis=-1, keepdims=True) + c3
        sdk = sig(dk)
        p2 = p2 + sdk
        p5 = p5 + sig(sk) * sdk

    # ---- true-path group: p3 ----
    p3 = jnp.zeros_like(p1)
    for p in range(P):
        tp = tp_ref[p].astype(f32)                                   # (TB, E)
        p3 = p3 + sig(jnp.sum(tp * v1, axis=-1, keepdims=True) + c3)

    # ---- false-path group: p4 (Q matmuls share the same (E, E) RHS) ----
    p4 = jnp.zeros_like(p1)
    for q in range(Q):
        t4 = jnp.dot(fs_ref[q], m_ref[...],
                     preferred_element_type=f32) + vxu               # (TB, E)
        ft = ft_ref[q].astype(f32)
        p4 = p4 + sig(jnp.sum(ft * t4, axis=-1, keepdims=True))

    a = coef_ref[0]
    b = coef_ref[1]
    c = coef_ref[2]
    bias1 = coef_ref[3]
    bias2 = coef_ref[4]
    out_ref[...] = (-(p1 - a * p2) - b * (p3 - c * p4)
                    + bias1 * jnp.abs(p1 + p2 - 1.0)
                    + bias2 * jnp.abs(p1 - p5))


def mynet_forward(params, a, b, c,
                  l_one_hot, l_sentences, false_k, t_path_s, t_path_t,
                  f_path_s, f_path_t, label, *, batch_tile=None,
                  in_dtype=jnp.bfloat16):
    # t_path_t only feeds U4 / p7 / p8, which never reach the returned p6.
    del t_path_t
    f32 = jnp.float32
    B, n_oh = l_one_hot.shape
    K, E = false_k.shape[1], false_k.shape[2]
    P = t_path_s.shape[1]
    Q = f_path_s.shape[1]
    H = params["U"].shape[1]                   # 64

    # ---- batch tile: largest multiple-of-8 divisor (<= 512) with >= 2 steps ----
    if batch_tile is None:
        TB = B
        if B % 8 == 0:
            for cand in (512, 256, 128, 64, 32, 16, 8):
                if cand < B and B % cand == 0:
                    TB = cand
                    break
    else:
        TB = batch_tile
    if not (TB == B or (B % TB == 0 and TB % 8 == 0)):
        raise ValueError("batch_tile must divide B and be a multiple of 8")
    nb = B // TB

    mmh = functools.partial(jnp.matmul, precision=_HIGHEST)

    # ---- offline weight folding (exact, f32) ----
    lin1_w = params["lin1_w"].astype(f32)            # (32, 424)
    lin1_b = params["lin1_b"].astype(f32)            # (32,)
    lin2_w = params["lin2_w"].astype(f32)            # (64, 376)
    lin2_b = params["lin2_b"].astype(f32)            # (64,)
    w_oh = lin2_w[:, :n_oh].T                        # (344, H)
    w_sb = lin2_w[:, n_oh:].T                        # (32, H)
    w_feat = jnp.concatenate([w_oh, mmh(lin1_w.T, w_sb)], axis=0)     # (768, H)
    b_feat = mmh(lin1_b[None, :], w_sb) + lin2_b[None, :]             # (1, H)

    U = params["U"].astype(f32)                      # (E, H)
    W1 = params["W1"].astype(f32)                    # (H, H)
    W2 = params["W2"].astype(f32)                    # (H, H)
    Ut = U.T                                         # (H, E)
    UW1 = mmh(U, W1)                                 # (E, H)
    M = mmh(UW1, Ut)                                 # (E, E)  = U W1 U^T
    N1 = mmh(U, UW1.T)                               # (E, E)  = U (U W1)^T
    N_lab = jnp.concatenate([U, N1], axis=1)         # (E, H + E)

    w_xw2 = mmh(w_feat, W2)
    W_big = jnp.concatenate(
        [w_feat, w_xw2, mmh(w_feat, Ut), mmh(w_xw2, Ut)], axis=1)     # (768, 2H+2E)
    b_xw2 = mmh(b_feat, W2)
    b_big = jnp.concatenate(
        [b_feat, b_xw2, mmh(b_feat, Ut), mmh(b_xw2, Ut)], axis=1)     # (1, 2H+2E)

    # ---- layout plumbing (wrapper-side only; bf16 HBM storage) ----
    feat = jnp.concatenate([l_one_hot, l_sentences], axis=1).astype(in_dtype)
    label_c = label.astype(in_dtype)                                  # (B, E)
    fk_t = jnp.transpose(false_k, (1, 0, 2)).astype(in_dtype)         # (K, B, E)
    tp_t = jnp.transpose(t_path_s, (1, 0, 2)).astype(in_dtype)        # (P, B, E)
    fs_t = jnp.transpose(f_path_s, (1, 0, 2)).astype(in_dtype)        # (Q, B, E)
    ft_t = jnp.transpose(f_path_t, (1, 0, 2)).astype(in_dtype)        # (Q, B, E)

    W_big = W_big.astype(in_dtype)
    N_lab = N_lab.astype(in_dtype)
    Mq = M.astype(in_dtype)
    b_big = b_big.astype(f32)

    coef = jnp.concatenate([
        jnp.asarray([a, b, c], dtype=f32),
        jnp.reshape(params["bias1"], (-1,)).astype(f32),
        jnp.reshape(params["bias2"], (-1,)).astype(f32),
    ])                                                # (5,) -> SMEM

    d_feat = feat.shape[1]

    def row2(rows, cols):
        return pl.BlockSpec((rows, cols), lambda i: (i, 0))

    def row3(lead, rows, cols):
        return pl.BlockSpec((lead, rows, cols), lambda i: (0, i, 0))

    def full2(arr):
        return pl.BlockSpec(arr.shape, lambda i: (0, 0))

    in_specs = [
        row2(TB, d_feat),        # feat
        row2(TB, E),             # label
        row3(K, TB, E),          # false_k    (item axis leading)
        row3(P, TB, E),          # t_path_s
        row3(Q, TB, E),          # f_path_s
        row3(Q, TB, E),          # f_path_t
        full2(W_big),
        full2(b_big),
        full2(N_lab),
        full2(Mq),
        pl.BlockSpec(memory_space=pltpu.MemorySpace.SMEM),   # a, b, c, bias1, bias2
    ]

    # VMEM budget: double-buffered row inputs + resident weights + slack.
    isz = jnp.zeros((), in_dtype).itemsize
    per_step = TB * (d_feat + E + (K + P + 2 * Q) * E) * isz
    weights = (W_big.size + N_lab.size + Mq.size) * isz + b_big.size * 4
    vmem_limit = int(min(100 * 1024 * 1024,
                         max(32 * 1024 * 1024,
                             4 * per_step + 2 * weights + (8 << 20))))

    kernel = functools.partial(mynet_kernel, h_dim=H, e_dim=E)
    return pl.pallas_call(
        kernel,
        out_shape=jax.ShapeDtypeStruct((B, 1), f32),
        grid=(nb,),
        in_specs=in_specs,
        out_specs=pl.BlockSpec((TB, 1), lambda i: (i, 0)),
        compiler_params=pltpu.CompilerParams(
            dimension_semantics=("parallel",),
            vmem_limit_bytes=vmem_limit,
        ),
    )(feat, label_c, fk_t, tp_t, fs_t, ft_t,
      W_big, b_big, N_lab, Mq, coef)


def mynet_reference(params, a, b, c,
                    l_one_hot, l_sentences, false_k, t_path_s, t_path_t,
                    f_path_s, f_path_t, label):
    # Pure-JAX mirror of the PyTorch forward (only the part feeding p6),
    # computed in f32 at HIGHEST precision.
    sig = jax.nn.sigmoid
    mm = functools.partial(jnp.matmul, precision=_HIGHEST)
    sv = mm(l_sentences, params["lin1_w"].T) + params["lin1_b"]
    x = mm(jnp.concatenate([l_one_hot, sv], axis=1),
           params["lin2_w"].T) + params["lin2_b"]
    x3 = x[:, :, None]                               # (B, 64, 1)
    xT = jnp.swapaxes(x3, 1, 2)                      # (B, 1, 64)
    U, W1, W2 = params["U"], params["W1"], params["W2"]
    U1 = mm(label, U)[:, None, :]                    # (B, 1, 64)
    p1 = sig(mm(U1, x3))[:, :, 0]
    U2 = mm(false_k, U)
    p2 = jnp.sum(sig(mm(U2, x3)), axis=1)
    U3 = mm(t_path_s, U)
    p3 = jnp.sum(sig(mm(mm(U3, W1) + mm(xT, W2),
                        jnp.swapaxes(U1, 1, 2))), axis=1)
    U5 = mm(f_path_s, U)
    U6 = mm(f_path_t, U)
    p4 = mm(U5, W1) + mm(xT, W2)
    p4 = jnp.sum(sig(mm(p4[:, :, None, :], U6[:, :, :, None])), axis=1)[:, :, 0]
    K = false_k.shape[1]
    p5_13 = (mm(U2, W1) + mm(jnp.tile(xT, (1, K, 1)), W2))[:, :, None, :]
    p5_14 = jnp.tile(U1, (1, K, 1))[:, :, :, None]
    p5_1 = sig(mm(p5_13, p5_14))[:, :, 0, :]
    p5_2 = sig(mm(U2, x3))
    p5 = jnp.sum(p5_1 * p5_2, axis=1)
    ones = jnp.ones((p2.shape[0], 1), jnp.float32)
    return (-(p1 - a * p2) - b * (p3 - c * p4)
            + params["bias1"] * jnp.abs(p1 + p2 - ones)
            + params["bias2"] * jnp.abs(p1 - p5))


if __name__ == "__main__":
    B, E, K, P, Q = 8, 64, 10, 6, 5
    D_SENT, D_OH = 424, 344
    sc = 0.1

    key = jax.random.PRNGKey(0)
    ks = jax.random.split(key, 17)

    l_one_hot = jax.random.randint(ks[0], (B, D_OH), 0, 2).astype(jnp.float32)
    l_sentences = jax.random.normal(ks[1], (B, D_SENT), jnp.float32) * sc
    false_k = jax.random.normal(ks[2], (B, K, E), jnp.float32) * sc
    t_path_s = jax.random.normal(ks[3], (B, P, E), jnp.float32) * sc
    t_path_t = jax.random.normal(ks[4], (B, P, E), jnp.float32) * sc
    f_path_s = jax.random.normal(ks[5], (B, Q, E), jnp.float32) * sc
    f_path_t = jax.random.normal(ks[6], (B, Q, E), jnp.float32) * sc
    label = jax.nn.one_hot(
        jax.random.randint(ks[7], (B,), 0, E), E, dtype=jnp.float32)

    params = dict(
        U=jax.random.normal(ks[8], (E, 64), jnp.float32) * sc,      # nn.Parameter(d)
        W1=jax.random.normal(ks[9], (64, 64), jnp.float32) * sc,
        W2=jax.random.normal(ks[10], (64, 64), jnp.float32) * sc,
        lin1_w=jax.random.normal(ks[11], (32, 424), jnp.float32) * sc,
        lin1_b=jax.random.normal(ks[12], (32,), jnp.float32) * sc,
        lin2_w=jax.random.normal(ks[13], (64, 376), jnp.float32) * sc,
        lin2_b=jax.random.normal(ks[14], (64,), jnp.float32) * sc,
        bias1=jax.random.normal(ks[15], (1,), jnp.float32),
        bias2=jax.random.normal(ks[16], (1,), jnp.float32),
    )
    a, b, c = 0.5, 0.3, 0.2

    out = mynet_forward(params, a, b, c,
                        l_one_hot, l_sentences, false_k, t_path_s, t_path_t,
                        f_path_s, f_path_t, label)
    out = jax.block_until_ready(out)

    ref = mynet_reference(params, a, b, c,
                          l_one_hot, l_sentences, false_k, t_path_s, t_path_t,
                          f_path_s, f_path_t, label)
    assert out.shape == (B, 1), out.shape
    # kernel stores inputs/weights in bf16 and uses default (single-pass bf16)
    # MXU precision with f32 accumulation; reference runs f32 @ HIGHEST ->
    # compare with a matching tolerance.
    assert jnp.allclose(out, ref, rtol=2e-2, atol=3e-2), (out, ref)
    print("KERNEL_OK")
</pallas_src>

<mosaic_0001>
module attributes {stable_mosaic.version = 11 : i64} {
  func.func @mynet_kernel(%arg0: i32, %arg1: memref<8x768xbf16, #tpu.memory_space<vmem>>, %arg2: memref<8x64xbf16, #tpu.memory_space<vmem>>, %arg3: memref<10x8x64xbf16, #tpu.memory_space<vmem>>, %arg4: memref<6x8x64xbf16, #tpu.memory_space<vmem>>, %arg5: memref<5x8x64xbf16, #tpu.memory_space<vmem>>, %arg6: memref<5x8x64xbf16, #tpu.memory_space<vmem>>, %arg7: memref<768x256xbf16, #tpu.memory_space<vmem>>, %arg8: memref<1x256xf32, #tpu.memory_space<vmem>>, %arg9: memref<64x128xbf16, #tpu.memory_space<vmem>>, %arg10: memref<64x64xbf16, #tpu.memory_space<vmem>>, %arg11: memref<5xf32, #tpu.memory_space<smem>>, %arg12: memref<8x1xf32, #tpu.memory_space<vmem>>) attributes {dimension_semantics = [#tpu.dimension_semantics<parallel>], iteration_bounds = array<i64: 1>, scalar_prefetch = 0 : i64, scratch_operands = 0 : i64, tpu.core_type = #tpu.core_type<tc>, window_params = [{transform_indices = @transform_0, window_bounds = array<i64: 8, 768>}, {transform_indices = @transform_1, window_bounds = array<i64: 8, 64>}, {transform_indices = @transform_2, window_bounds = array<i64: 10, 8, 64>}, {transform_indices = @transform_3, window_bounds = array<i64: 6, 8, 64>}, {transform_indices = @transform_4, window_bounds = array<i64: 5, 8, 64>}, {transform_indices = @transform_5, window_bounds = array<i64: 5, 8, 64>}, {pipeline_mode = #tpu.pipeline_mode<synchronous>, transform_indices = @transform_6, window_bounds = array<i64: 768, 256>}, {pipeline_mode = #tpu.pipeline_mode<synchronous>, transform_indices = @transform_7, window_bounds = array<i64: 1, 256>}, {pipeline_mode = #tpu.pipeline_mode<synchronous>, transform_indices = @transform_8, window_bounds = array<i64: 64, 128>}, {pipeline_mode = #tpu.pipeline_mode<synchronous>, transform_indices = @transform_9, window_bounds = array<i64: 64, 64>}, {transform_indices = @transform_10, window_bounds = array<i64: 5>}, {transform_indices = @transform_11, window_bounds = array<i64: 8, 1>}]} {
    %c0 = arith.constant 0 : index
    %c0_0 = arith.constant 0 : index
    %0 = vector.load %arg1[%c0, %c0_0] : memref<8x768xbf16, #tpu.memory_space<vmem>>, vector<8x768xbf16>
    %c0_1 = arith.constant 0 : index
    %c0_2 = arith.constant 0 : index
    %1 = vector.load %arg7[%c0_1, %c0_2] : memref<768x256xbf16, #tpu.memory_space<vmem>>, vector<768x256xbf16>
    %cst = arith.constant dense<0.000000e+00> : vector<8x256xf32>
    %2 = tpu.matmul %0, %1, %cst {dimension_numbers = #tpu.dot_dimension_numbers<[1], [0], [0], [1], [0, 0, 1, 1], [], []>} : vector<8x768xbf16>, vector<768x256xbf16>, vector<8x256xf32> -> vector<8x256xf32>
    %c0_3 = arith.constant 0 : index
    %c0_4 = arith.constant 0 : index
    %3 = vector.load %arg8[%c0_3, %c0_4] : memref<1x256xf32, #tpu.memory_space<vmem>>, vector<1x256xf32>
    %4 = vector.broadcast %3 : vector<1x256xf32> to vector<8x256xf32>
    %5 = arith.addf %2, %4 : vector<8x256xf32>
    %6 = vector.extract_strided_slice %5 {offsets = [0, 0], sizes = [8, 64], strides = [1, 1]} : vector<8x256xf32> to vector<8x64xf32>
    %7 = vector.extract_strided_slice %5 {offsets = [0, 64], sizes = [8, 64], strides = [1, 1]} : vector<8x256xf32> to vector<8x64xf32>
    %8 = vector.extract_strided_slice %5 {offsets = [0, 128], sizes = [8, 64], strides = [1, 1]} : vector<8x256xf32> to vector<8x64xf32>
    %9 = vector.extract_strided_slice %5 {offsets = [0, 192], sizes = [8, 64], strides = [1, 1]} : vector<8x256xf32> to vector<8x64xf32>
    %c0_5 = arith.constant 0 : index
    %c0_6 = arith.constant 0 : index
    %10 = vector.load %arg2[%c0_5, %c0_6] : memref<8x64xbf16, #tpu.memory_space<vmem>>, vector<8x64xbf16>
    %c0_7 = arith.constant 0 : index
    %c0_8 = arith.constant 0 : index
    %11 = vector.load %arg9[%c0_7, %c0_8] : memref<64x128xbf16, #tpu.memory_space<vmem>>, vector<64x128xbf16>
    %cst_9 = arith.constant dense<0.000000e+00> : vector<8x128xf32>
    %12 = tpu.matmul %10, %11, %cst_9 {dimension_numbers = #tpu.dot_dimension_numbers<[1], [0], [0], [1], [0, 0, 1, 1], [], []>} : vector<8x64xbf16>, vector<64x128xbf16>, vector<8x128xf32> -> vector<8x128xf32>
    %13 = vector.extract_strided_slice %12 {offsets = [0, 0], sizes = [8, 64], strides = [1, 1]} : vector<8x128xf32> to vector<8x64xf32>
    %14 = vector.extract_strided_slice %12 {offsets = [0, 64], sizes = [8, 64], strides = [1, 1]} : vector<8x128xf32> to vector<8x64xf32>
    %15 = arith.mulf %13, %6 : vector<8x64xf32>
    %cst_10 = arith.constant dense<0.000000e+00> : vector<8xf32>
    %16 = vector.multi_reduction <add>, %15, %cst_10 [1] : vector<8x64xf32> to vector<8xf32>
    %17 = vector.shape_cast %16 : vector<8xf32> to vector<8x1xf32>
    %18 = arith.negf %17 : vector<8x1xf32>
    %19 = math.exp %18 : vector<8x1xf32>
    %cst_11 = arith.constant 1.000000e+00 : f32
    %20 = vector.broadcast %cst_11 : f32 to vector<8x1xf32>
    %21 = arith.addf %20, %19 : vector<8x1xf32>
    %22 = arith.divf %20, %21 : vector<8x1xf32>
    %23 = arith.mulf %13, %7 : vector<8x64xf32>
    %cst_12 = arith.constant dense<0.000000e+00> : vector<8xf32>
    %24 = vector.multi_reduction <add>, %23, %cst_12 [1] : vector<8x64xf32> to vector<8xf32>
    %25 = vector.shape_cast %24 : vector<8xf32> to vector<8x1xf32>
    %cst_13 = arith.constant 0.000000e+00 : f32
    %26 = vector.broadcast %cst_13 : f32 to vector<8x1xf32>
    %cst_14 = arith.constant 0.000000e+00 : f32
    %27 = vector.broadcast %cst_14 : f32 to vector<8x1xf32>
    %c0_15 = arith.constant 0 : index
    %c0_16 = arith.constant 0 : index
    %c0_17 = arith.constant 0 : index
    %28 = vector.load %arg3[%c0_15, %c0_16, %c0_17] : memref<10x8x64xbf16, #tpu.memory_space<vmem>>, vector<1x8x64xbf16>
    %29 = vector.shape_cast %28 : vector<1x8x64xbf16> to vector<8x64xbf16>
    %30 = arith.extf %29 : vector<8x64xbf16> to vector<8x64xf32>
    %31 = arith.mulf %30, %8 : vector<8x64xf32>
    %cst_18 = arith.constant dense<0.000000e+00> : vector<8xf32>
    %32 = vector.multi_reduction <add>, %31, %cst_18 [1] : vector<8x64xf32> to vector<8xf32>
    %33 = vector.shape_cast %32 : vector<8xf32> to vector<8x1xf32>
    %34 = arith.mulf %30, %14 : vector<8x64xf32>
    %cst_19 = arith.constant dense<0.000000e+00> : vector<8xf32>
    %35 = vector.multi_reduction <add>, %34, %cst_19 [1] : vector<8x64xf32> to vector<8xf32>
    %36 = vector.shape_cast %35 : vector<8xf32> to vector<8x1xf32>
    %37 = arith.addf %36, %25 : vector<8x1xf32>
    %38 = arith.negf %33 : vector<8x1xf32>
    %39 = math.exp %38 : vector<8x1xf32>
    %cst_20 = arith.constant 1.000000e+00 : f32
    %40 = vector.broadcast %cst_20 : f32 to vector<8x1xf32>
    %41 = arith.addf %40, %39 : vector<8x1xf32>
    %42 = arith.divf %40, %41 : vector<8x1xf32>
    %43 = arith.addf %26, %42 : vector<8x1xf32>
    %44 = arith.negf %37 : vector<8x1xf32>
    %45 = math.exp %44 : vector<8x1xf32>
    %cst_21 = arith.constant 1.000000e+00 : f32
    %46 = vector.broadcast %cst_21 : f32 to vector<8x1xf32>
    %47 = arith.addf %46, %45 : vector<8x1xf32>
    %48 = arith.divf %46, %47 : vector<8x1xf32>
    %49 = arith.mulf %48, %42 : vector<8x1xf32>
    %50 = arith.addf %27, %49 : vector<8x1xf32>
    %c1 = arith.constant 1 : index
    %c0_22 = arith.constant 0 : index
    %c0_23 = arith.constant 0 : index
    %51 = vector.load %arg3[%c1, %c0_22, %c0_23] : memref<10x8x64xbf16, #tpu.memory_space<vmem>>, vector<1x8x64xbf16>
    %52 = vector.shape_cast %51 : vector<1x8x64xbf16> to vector<8x64xbf16>
    %53 = arith.extf %52 : vector<8x64xbf16> to vector<8x64xf32>
    %54 = arith.mulf %53, %8 : vector<8x64xf32>
    %cst_24 = arith.constant dense<0.000000e+00> : vector<8xf32>
    %55 = vector.multi_reduction <add>, %54, %cst_24 [1] : vector<8x64xf32> to vector<8xf32>
    %56 = vector.shape_cast %55 : vector<8xf32> to vector<8x1xf32>
    %57 = arith.mulf %53, %14 : vector<8x64xf32>
    %cst_25 = arith.constant dense<0.000000e+00> : vector<8xf32>
    %58 = vector.multi_reduction <add>, %57, %cst_25 [1] : vector<8x64xf32> to vector<8xf32>
    %59 = vector.shape_cast %58 : vector<8xf32> to vector<8x1xf32>
    %60 = arith.addf %59, %25 : vector<8x1xf32>
    %61 = arith.negf %56 : vector<8x1xf32>
    %62 = math.exp %61 : vector<8x1xf32>
    %cst_26 = arith.constant 1.000000e+00 : f32
    %63 = vector.broadcast %cst_26 : f32 to vector<8x1xf32>
    %64 = arith.addf %63, %62 : vector<8x1xf32>
    %65 = arith.divf %63, %64 : vector<8x1xf32>
    %66 = arith.addf %43, %65 : vector<8x1xf32>
    %67 = arith.negf %60 : vector<8x1xf32>
    %68 = math.exp %67 : vector<8x1xf32>
    %cst_27 = arith.constant 1.000000e+00 : f32
    %69 = vector.broadcast %cst_27 : f32 to vector<8x1xf32>
    %70 = arith.addf %69, %68 : vector<8x1xf32>
    %71 = arith.divf %69, %70 : vector<8x1xf32>
    %72 = arith.mulf %71, %65 : vector<8x1xf32>
    %73 = arith.addf %50, %72 : vector<8x1xf32>
    %c2 = arith.constant 2 : index
    %c0_28 = arith.constant 0 : index
    %c0_29 = arith.constant 0 : index
    %74 = vector.load %arg3[%c2, %c0_28, %c0_29] : memref<10x8x64xbf16, #tpu.memory_space<vmem>>, vector<1x8x64xbf16>
    %75 = vector.shape_cast %74 : vector<1x8x64xbf16> to vector<8x64xbf16>
    %76 = arith.extf %75 : vector<8x64xbf16> to vector<8x64xf32>
    %77 = arith.mulf %76, %8 : vector<8x64xf32>
    %cst_30 = arith.constant dense<0.000000e+00> : vector<8xf32>
    %78 = vector.multi_reduction <add>, %77, %cst_30 [1] : vector<8x64xf32> to vector<8xf32>
    %79 = vector.shape_cast %78 : vector<8xf32> to vector<8x1xf32>
    %80 = arith.mulf %76, %14 : vector<8x64xf32>
    %cst_31 = arith.constant dense<0.000000e+00> : vector<8xf32>
    %81 = vector.multi_reduction <add>, %80, %cst_31 [1] : vector<8x64xf32> to vector<8xf32>
    %82 = vector.shape_cast %81 : vector<8xf32> to vector<8x1xf32>
    %83 = arith.addf %82, %25 : vector<8x1xf32>
    %84 = arith.negf %79 : vector<8x1xf32>
    %85 = math.exp %84 : vector<8x1xf32>
    %cst_32 = arith.constant 1.000000e+00 : f32
    %86 = vector.broadcast %cst_32 : f32 to vector<8x1xf32>
    %87 = arith.addf %86, %85 : vector<8x1xf32>
    %88 = arith.divf %86, %87 : vector<8x1xf32>
    %89 = arith.addf %66, %88 : vector<8x1xf32>
    %90 = arith.negf %83 : vector<8x1xf32>
    %91 = math.exp %90 : vector<8x1xf32>
    %cst_33 = arith.constant 1.000000e+00 : f32
    %92 = vector.broadcast %cst_33 : f32 to vector<8x1xf32>
    %93 = arith.addf %92, %91 : vector<8x1xf32>
    %94 = arith.divf %92, %93 : vector<8x1xf32>
    %95 = arith.mulf %94, %88 : vector<8x1xf32>
    %96 = arith.addf %73, %95 : vector<8x1xf32>
    %c3 = arith.constant 3 : index
    %c0_34 = arith.constant 0 : index
    %c0_35 = arith.constant 0 : index
    %97 = vector.load %arg3[%c3, %c0_34, %c0_35] : memref<10x8x64xbf16, #tpu.memory_space<vmem>>, vector<1x8x64xbf16>
    %98 = vector.shape_cast %97 : vector<1x8x64xbf16> to vector<8x64xbf16>
    %99 = arith.extf %98 : vector<8x64xbf16> to vector<8x64xf32>
    %100 = arith.mulf %99, %8 : vector<8x64xf32>
    %cst_36 = arith.constant dense<0.000000e+00> : vector<8xf32>
    %101 = vector.multi_reduction <add>, %100, %cst_36 [1] : vector<8x64xf32> to vector<8xf32>
    %102 = vector.shape_cast %101 : vector<8xf32> to vector<8x1xf32>
    %103 = arith.mulf %99, %14 : vector<8x64xf32>
    %cst_37 = arith.constant dense<0.000000e+00> : vector<8xf32>
    %104 = vector.multi_reduction <add>, %103, %cst_37 [1] : vector<8x64xf32> to vector<8xf32>
    %105 = vector.shape_cast %104 : vector<8xf32> to vector<8x1xf32>
    %106 = arith.addf %105, %25 : vector<8x1xf32>
    %107 = arith.negf %102 : vector<8x1xf32>
    %108 = math.exp %107 : vector<8x1xf32>
    %cst_38 = arith.constant 1.000000e+00 : f32
    %109 = vector.broadcast %cst_38 : f32 to vector<8x1xf32>
    %110 = arith.addf %109, %108 : vector<8x1xf32>
    %111 = arith.divf %109, %110 : vector<8x1xf32>
    %112 = arith.addf %89, %111 : vector<8x1xf32>
    %113 = arith.negf %106 : vector<8x1xf32>
    %114 = math.exp %113 : vector<8x1xf32>
    %cst_39 = arith.constant 1.000000e+00 : f32
    %115 = vector.broadcast %cst_39 : f32 to vector<8x1xf32>
    %116 = arith.addf %115, %114 : vector<8x1xf32>
    %117 = arith.divf %115, %116 : vector<8x1xf32>
    %118 = arith.mulf %117, %111 : vector<8x1xf32>
    %119 = arith.addf %96, %118 : vector<8x1xf32>
    %c4 = arith.constant 4 : index
    %c0_40 = arith.constant 0 : index
    %c0_41 = arith.constant 0 : index
    %120 = vector.load %arg3[%c4, %c0_40, %c0_41] : memref<10x8x64xbf16, #tpu.memory_space<vmem>>, vector<1x8x64xbf16>
    %121 = vector.shape_cast %120 : vector<1x8x64xbf16> to vector<8x64xbf16>
    %122 = arith.extf %121 : vector<8x64xbf16> to vector<8x64xf32>
    %123 = arith.mulf %122, %8 : vector<8x64xf32>
    %cst_42 = arith.constant dense<0.000000e+00> : vector<8xf32>
    %124 = vector.multi_reduction <add>, %123, %cst_42 [1] : vector<8x64xf32> to vector<8xf32>
    %125 = vector.shape_cast %124 : vector<8xf32> to vector<8x1xf32>
    %126 = arith.mulf %122, %14 : vector<8x64xf32>
    %cst_43 = arith.constant dense<0.000000e+00> : vector<8xf32>
    %127 = vector.multi_reduction <add>, %126, %cst_43 [1] : vector<8x64xf32> to vector<8xf32>
    %128 = vector.shape_cast %127 : vector<8xf32> to vector<8x1xf32>
    %129 = arith.addf %128, %25 : vector<8x1xf32>
    %130 = arith.negf %125 : vector<8x1xf32>
    %131 = math.exp %130 : vector<8x1xf32>
    %cst_44 = arith.constant 1.000000e+00 : f32
    %132 = vector.broadcast %cst_44 : f32 to vector<8x1xf32>
    %133 = arith.addf %132, %131 : vector<8x1xf32>
    %134 = arith.divf %132, %133 : vector<8x1xf32>
    %135 = arith.addf %112, %134 : vector<8x1xf32>
    %136 = arith.negf %129 : vector<8x1xf32>
    %137 = math.exp %136 : vector<8x1xf32>
    %cst_45 = arith.constant 1.000000e+00 : f32
    %138 = vector.broadcast %cst_45 : f32 to vector<8x1xf32>
    %139 = arith.addf %138, %137 : vector<8x1xf32>
    %140 = arith.divf %138, %139 : vector<8x1xf32>
    %141 = arith.mulf %140, %134 : vector<8x1xf32>
    %142 = arith.addf %119, %141 : vector<8x1xf32>
    %c5 = arith.constant 5 : index
    %c0_46 = arith.constant 0 : index
    %c0_47 = arith.constant 0 : index
    %143 = vector.load %arg3[%c5, %c0_46, %c0_47] : memref<10x8x64xbf16, #tpu.memory_space<vmem>>, vector<1x8x64xbf16>
    %144 = vector.shape_cast %143 : vector<1x8x64xbf16> to vector<8x64xbf16>
    %145 = arith.extf %144 : vector<8x64xbf16> to vector<8x64xf32>
    %146 = arith.mulf %145, %8 : vector<8x64xf32>
    %cst_48 = arith.constant dense<0.000000e+00> : vector<8xf32>
    %147 = vector.multi_reduction <add>, %146, %cst_48 [1] : vector<8x64xf32> to vector<8xf32>
    %148 = vector.shape_cast %147 : vector<8xf32> to vector<8x1xf32>
    %149 = arith.mulf %145, %14 : vector<8x64xf32>
    %cst_49 = arith.constant dense<0.000000e+00> : vector<8xf32>
    %150 = vector.multi_reduction <add>, %149, %cst_49 [1] : vector<8x64xf32> to vector<8xf32>
    %151 = vector.shape_cast %150 : vector<8xf32> to vector<8x1xf32>
    %152 = arith.addf %151, %25 : vector<8x1xf32>
    %153 = arith.negf %148 : vector<8x1xf32>
    %154 = math.exp %153 : vector<8x1xf32>
    %cst_50 = arith.constant 1.000000e+00 : f32
    %155 = vector.broadcast %cst_50 : f32 to vector<8x1xf32>
    %156 = arith.addf %155, %154 : vector<8x1xf32>
    %157 = arith.divf %155, %156 : vector<8x1xf32>
    %158 = arith.addf %135, %157 : vector<8x1xf32>
    %159 = arith.negf %152 : vector<8x1xf32>
    %160 = math.exp %159 : vector<8x1xf32>
    %cst_51 = arith.constant 1.000000e+00 : f32
    %161 = vector.broadcast %cst_51 : f32 to vector<8x1xf32>
    %162 = arith.addf %161, %160 : vector<8x1xf32>
    %163 = arith.divf %161, %162 : vector<8x1xf32>
    %164 = arith.mulf %163, %157 : vector<8x1xf32>
    %165 = arith.addf %142, %164 : vector<8x1xf32>
    %c6 = arith.constant 6 : index
    %c0_52 = arith.constant 0 : index
    %c0_53 = arith.constant 0 : index
    %166 = vector.load %arg3[%c6, %c0_52, %c0_53] : memref<10x8x64xbf16, #tpu.memory_space<vmem>>, vector<1x8x64xbf16>
    %167 = vector.shape_cast %166 : vector<1x8x64xbf16> to vector<8x64xbf16>
    %168 = arith.extf %167 : vector<8x64xbf16> to vector<8x64xf32>
    %169 = arith.mulf %168, %8 : vector<8x64xf32>
    %cst_54 = arith.constant dense<0.000000e+00> : vector<8xf32>
    %170 = vector.multi_reduction <add>, %169, %cst_54 [1] : vector<8x64xf32> to vector<8xf32>
    %171 = vector.shape_cast %170 : vector<8xf32> to vector<8x1xf32>
    %172 = arith.mulf %168, %14 : vector<8x64xf32>
    %cst_55 = arith.constant dense<0.000000e+00> : vector<8xf32>
    %173 = vector.multi_reduction <add>, %172, %cst_55 [1] : vector<8x64xf32> to vector<8xf32>
    %174 = vector.shape_cast %173 : vector<8xf32> to vector<8x1xf32>
    %175 = arith.addf %174, %25 : vector<8x1xf32>
    %176 = arith.negf %171 : vector<8x1xf32>
    %177 = math.exp %176 : vector<8x1xf32>
    %cst_56 = arith.constant 1.000000e+00 : f32
    %178 = vector.broadcast %cst_56 : f32 to vector<8x1xf32>
    %179 = arith.addf %178, %177 : vector<8x1xf32>
    %180 = arith.divf %178, %179 : vector<8x1xf32>
    %181 = arith.addf %158, %180 : vector<8x1xf32>
    %182 = arith.negf %175 : vector<8x1xf32>
    %183 = math.exp %182 : vector<8x1xf32>
    %cst_57 = arith.constant 1.000000e+00 : f32
    %184 = vector.broadcast %cst_57 : f32 to vector<8x1xf32>
    %185 = arith.addf %184, %183 : vector<8x1xf32>
    %186 = arith.divf %184, %185 : vector<8x1xf32>
    %187 = arith.mulf %186, %180 : vector<8x1xf32>
    %188 = arith.addf %165, %187 : vector<8x1xf32>
    %c7 = arith.constant 7 : index
    %c0_58 = arith.constant 0 : index
    %c0_59 = arith.constant 0 : index
    %189 = vector.load %arg3[%c7, %c0_58, %c0_59] : memref<10x8x64xbf16, #tpu.memory_space<vmem>>, vector<1x8x64xbf16>
    %190 = vector.shape_cast %189 : vector<1x8x64xbf16> to vector<8x64xbf16>
    %191 = arith.extf %190 : vector<8x64xbf16> to vector<8x64xf32>
    %192 = arith.mulf %191, %8 : vector<8x64xf32>
    %cst_60 = arith.constant dense<0.000000e+00> : vector<8xf32>
    %193 = vector.multi_reduction <add>, %192, %cst_60 [1] : vector<8x64xf32> to vector<8xf32>
    %194 = vector.shape_cast %193 : vector<8xf32> to vector<8x1xf32>
    %195 = arith.mulf %191, %14 : vector<8x64xf32>
    %cst_61 = arith.constant dense<0.000000e+00> : vector<8xf32>
    %196 = vector.multi_reduction <add>, %195, %cst_61 [1] : vector<8x64xf32> to vector<8xf32>
    %197 = vector.shape_cast %196 : vector<8xf32> to vector<8x1xf32>
    %198 = arith.addf %197, %25 : vector<8x1xf32>
    %199 = arith.negf %194 : vector<8x1xf32>
    %200 = math.exp %199 : vector<8x1xf32>
    %cst_62 = arith.constant 1.000000e+00 : f32
    %201 = vector.broadcast %cst_62 : f32 to vector<8x1xf32>
    %202 = arith.addf %201, %200 : vector<8x1xf32>
    %203 = arith.divf %201, %202 : vector<8x1xf32>
    %204 = arith.addf %181, %203 : vector<8x1xf32>
    %205 = arith.negf %198 : vector<8x1xf32>
    %206 = math.exp %205 : vector<8x1xf32>
    %cst_63 = arith.constant 1.000000e+00 : f32
    %207 = vector.broadcast %cst_63 : f32 to vector<8x1xf32>
    %208 = arith.addf %207, %206 : vector<8x1xf32>
    %209 = arith.divf %207, %208 : vector<8x1xf32>
    %210 = arith.mulf %209, %203 : vector<8x1xf32>
    %211 = arith.addf %188, %210 : vector<8x1xf32>
    %c8 = arith.constant 8 : index
    %c0_64 = arith.constant 0 : index
    %c0_65 = arith.constant 0 : index
    %212 = vector.load %arg3[%c8, %c0_64, %c0_65] : memref<10x8x64xbf16, #tpu.memory_space<vmem>>, vector<1x8x64xbf16>
    %213 = vector.shape_cast %212 : vector<1x8x64xbf16> to vector<8x64xbf16>
    %214 = arith.extf %213 : vector<8x64xbf16> to vector<8x64xf32>
    %215 = arith.mulf %214, %8 : vector<8x64xf32>
    %cst_66 = arith.constant dense<0.000000e+00> : vector<8xf32>
    %216 = vector.multi_reduction <add>, %215, %cst_66 [1] : vector<8x64xf32> to vector<8xf32>
    %217 = vector.shape_cast %216 : vector<8xf32> to vector<8x1xf32>
    %218 = arith.mulf %214, %14 : vector<8x64xf32>
    %cst_67 = arith.constant dense<0.000000e+00> : vector<8xf32>
    %219 = vector.multi_reduction <add>, %218, %cst_67 [1] : vector<8x64xf32> to vector<8xf32>
    %220 = vector.shape_cast %219 : vector<8xf32> to vector<8x1xf32>
    %221 = arith.addf %220, %25 : vector<8x1xf32>
    %222 = arith.negf %217 : vector<8x1xf32>
    %223 = math.exp %222 : vector<8x1xf32>
    %cst_68 = arith.constant 1.000000e+00 : f32
    %224 = vector.broadcast %cst_68 : f32 to vector<8x1xf32>
    %225 = arith.addf %224, %223 : vector<8x1xf32>
    %226 = arith.divf %224, %225 : vector<8x1xf32>
    %227 = arith.addf %204, %226 : vector<8x1xf32>
    %228 = arith.negf %221 : vector<8x1xf32>
    %229 = math.exp %228 : vector<8x1xf32>
    %cst_69 = arith.constant 1.000000e+00 : f32
    %230 = vector.broadcast %cst_69 : f32 to vector<8x1xf32>
    %231 = arith.addf %230, %229 : vector<8x1xf32>
    %232 = arith.divf %230, %231 : vector<8x1xf32>
    %233 = arith.mulf %232, %226 : vector<8x1xf32>
    %234 = arith.addf %211, %233 : vector<8x1xf32>
    %c9 = arith.constant 9 : index
    %c0_70 = arith.constant 0 : index
    %c0_71 = arith.constant 0 : index
    %235 = vector.load %arg3[%c9, %c0_70, %c0_71] : memref<10x8x64xbf16, #tpu.memory_space<vmem>>, vector<1x8x64xbf16>
    %236 = vector.shape_cast %235 : vector<1x8x64xbf16> to vector<8x64xbf16>
    %237 = arith.extf %236 : vector<8x64xbf16> to vector<8x64xf32>
    %238 = arith.mulf %237, %8 : vector<8x64xf32>
    %cst_72 = arith.constant dense<0.000000e+00> : vector<8xf32>
    %239 = vector.multi_reduction <add>, %238, %cst_72 [1] : vector<8x64xf32> to vector<8xf32>
    %240 = vector.shape_cast %239 : vector<8xf32> to vector<8x1xf32>
    %241 = arith.mulf %237, %14 : vector<8x64xf32>
    %cst_73 = arith.constant dense<0.000000e+00> : vector<8xf32>
    %242 = vector.multi_reduction <add>, %241, %cst_73 [1] : vector<8x64xf32> to vector<8xf32>
    %243 = vector.shape_cast %242 : vector<8xf32> to vector<8x1xf32>
    %244 = arith.addf %243, %25 : vector<8x1xf32>
    %245 = arith.negf %240 : vector<8x1xf32>
    %246 = math.exp %245 : vector<8x1xf32>
    %cst_74 = arith.constant 1.000000e+00 : f32
    %247 = vector.broadcast %cst_74 : f32 to vector<8x1xf32>
    %248 = arith.addf %247, %246 : vector<8x1xf32>
    %249 = arith.divf %247, %248 : vector<8x1xf32>
    %250 = arith.addf %227, %249 : vector<8x1xf32>
    %251 = arith.negf %244 : vector<8x1xf32>
    %252 = math.exp %251 : vector<8x1xf32>
    %cst_75 = arith.constant 1.000000e+00 : f32
    %253 = vector.broadcast %cst_75 : f32 to vector<8x1xf32>
    %254 = arith.addf %253, %252 : vector<8x1xf32>
    %255 = arith.divf %253, %254 : vector<8x1xf32>
    %256 = arith.mulf %255, %249 : vector<8x1xf32>
    %257 = arith.addf %234, %256 : vector<8x1xf32>
    %cst_76 = arith.constant 0.000000e+00 : f32
    %258 = vector.broadcast %cst_76 : f32 to vector<8x1xf32>
    %c0_77 = arith.constant 0 : index
    %c0_78 = arith.constant 0 : index
    %c0_79 = arith.constant 0 : index
    %259 = vector.load %arg4[%c0_77, %c0_78, %c0_79] : memref<6x8x64xbf16, #tpu.memory_space<vmem>>, vector<1x8x64xbf16>
    %260 = vector.shape_cast %259 : vector<1x8x64xbf16> to vector<8x64xbf16>
    %261 = arith.extf %260 : vector<8x64xbf16> to vector<8x64xf32>
    %262 = arith.mulf %261, %14 : vector<8x64xf32>
    %cst_80 = arith.constant dense<0.000000e+00> : vector<8xf32>
    %263 = vector.multi_reduction <add>, %262, %cst_80 [1] : vector<8x64xf32> to vector<8xf32>
    %264 = vector.shape_cast %263 : vector<8xf32> to vector<8x1xf32>
    %265 = arith.addf %264, %25 : vector<8x1xf32>
    %266 = arith.negf %265 : vector<8x1xf32>
    %267 = math.exp %266 : vector<8x1xf32>
    %cst_81 = arith.constant 1.000000e+00 : f32
    %268 = vector.broadcast %cst_81 : f32 to vector<8x1xf32>
    %269 = arith.addf %268, %267 : vector<8x1xf32>
    %270 = arith.divf %268, %269 : vector<8x1xf32>
    %271 = arith.addf %258, %270 : vector<8x1xf32>
    %c1_82 = arith.constant 1 : index
    %c0_83 = arith.constant 0 : index
    %c0_84 = arith.constant 0 : index
    %272 = vector.load %arg4[%c1_82, %c0_83, %c0_84] : memref<6x8x64xbf16, #tpu.memory_space<vmem>>, vector<1x8x64xbf16>
    %273 = vector.shape_cast %272 : vector<1x8x64xbf16> to vector<8x64xbf16>
    %274 = arith.extf %273 : vector<8x64xbf16> to vector<8x64xf32>
    %275 = arith.mulf %274, %14 : vector<8x64xf32>
    %cst_85 = arith.constant dense<0.000000e+00> : vector<8xf32>
    %276 = vector.multi_reduction <add>, %275, %cst_85 [1] : vector<8x64xf32> to vector<8xf32>
    %277 = vector.shape_cast %276 : vector<8xf32> to vector<8x1xf32>
    %278 = arith.addf %277, %25 : vector<8x1xf32>
    %279 = arith.negf %278 : vector<8x1xf32>
    %280 = math.exp %279 : vector<8x1xf32>
    %cst_86 = arith.constant 1.000000e+00 : f32
    %281 = vector.broadcast %cst_86 : f32 to vector<8x1xf32>
    %282 = arith.addf %281, %280 : vector<8x1xf32>
    %283 = arith.divf %281, %282 : vector<8x1xf32>
    %284 = arith.addf %271, %283 : vector<8x1xf32>
    %c2_87 = arith.constant 2 : index
    %c0_88 = arith.constant 0 : index
    %c0_89 = arith.constant 0 : index
    %285 = vector.load %arg4[%c2_87, %c0_88, %c0_89] : memref<6x8x64xbf16, #tpu.memory_space<vmem>>, vector<1x8x64xbf16>
    %286 = vector.shape_cast %285 : vector<1x8x64xbf16> to vector<8x64xbf16>
    %287 = arith.extf %286 : vector<8x64xbf16> to vector<8x64xf32>
    %288 = arith.mulf %287, %14 : vector<8x64xf32>
    %cst_90 = arith.constant dense<0.000000e+00> : vector<8xf32>
    %289 = vector.multi_reduction <add>, %288, %cst_90 [1] : vector<8x64xf32> to vector<8xf32>
    %290 = vector.shape_cast %289 : vector<8xf32> to vector<8x1xf32>
    %291 = arith.addf %290, %25 : vector<8x1xf32>
    %292 = arith.negf %291 : vector<8x1xf32>
    %293 = math.exp %292 : vector<8x1xf32>
    %cst_91 = arith.constant 1.000000e+00 : f32
    %294 = vector.broadcast %cst_91 : f32 to vector<8x1xf32>
    %295 = arith.addf %294, %293 : vector<8x1xf32>
    %296 = arith.divf %294, %295 : vector<8x1xf32>
    %297 = arith.addf %284, %296 : vector<8x1xf32>
    %c3_92 = arith.constant 3 : index
    %c0_93 = arith.constant 0 : index
    %c0_94 = arith.constant 0 : index
    %298 = vector.load %arg4[%c3_92, %c0_93, %c0_94] : memref<6x8x64xbf16, #tpu.memory_space<vmem>>, vector<1x8x64xbf16>
    %299 = vector.shape_cast %298 : vector<1x8x64xbf16> to vector<8x64xbf16>
    %300 = arith.extf %299 : vector<8x64xbf16> to vector<8x64xf32>
    %301 = arith.mulf %300, %14 : vector<8x64xf32>
    %cst_95 = arith.constant dense<0.000000e+00> : vector<8xf32>
    %302 = vector.multi_reduction <add>, %301, %cst_95 [1] : vector<8x64xf32> to vector<8xf32>
    %303 = vector.shape_cast %302 : vector<8xf32> to vector<8x1xf32>
    %304 = arith.addf %303, %25 : vector<8x1xf32>
    %305 = arith.negf %304 : vector<8x1xf32>
    %306 = math.exp %305 : vector<8x1xf32>
    %cst_96 = arith.constant 1.000000e+00 : f32
    %307 = vector.broadcast %cst_96 : f32 to vector<8x1xf32>
    %308 = arith.addf %307, %306 : vector<8x1xf32>
    %309 = arith.divf %307, %308 : vector<8x1xf32>
    %310 = arith.addf %297, %309 : vector<8x1xf32>
    %c4_97 = arith.constant 4 : index
    %c0_98 = arith.constant 0 : index
    %c0_99 = arith.constant 0 : index
    %311 = vector.load %arg4[%c4_97, %c0_98, %c0_99] : memref<6x8x64xbf16, #tpu.memory_space<vmem>>, vector<1x8x64xbf16>
    %312 = vector.shape_cast %311 : vector<1x8x64xbf16> to vector<8x64xbf16>
    %313 = arith.extf %312 : vector<8x64xbf16> to vector<8x64xf32>
    %314 = arith.mulf %313, %14 : vector<8x64xf32>
    %cst_100 = arith.constant dense<0.000000e+00> : vector<8xf32>
    %315 = vector.multi_reduction <add>, %314, %cst_100 [1] : vector<8x64xf32> to vector<8xf32>
    %316 = vector.shape_cast %315 : vector<8xf32> to vector<8x1xf32>
    %317 = arith.addf %316, %25 : vector<8x1xf32>
    %318 = arith.negf %317 : vector<8x1xf32>
    %319 = math.exp %318 : vector<8x1xf32>
    %cst_101 = arith.constant 1.000000e+00 : f32
    %320 = vector.broadcast %cst_101 : f32 to vector<8x1xf32>
    %321 = arith.addf %320, %319 : vector<8x1xf32>
    %322 = arith.divf %320, %321 : vector<8x1xf32>
    %323 = arith.addf %310, %322 : vector<8x1xf32>
    %c5_102 = arith.constant 5 : index
    %c0_103 = arith.constant 0 : index
    %c0_104 = arith.constant 0 : index
    %324 = vector.load %arg4[%c5_102, %c0_103, %c0_104] : memref<6x8x64xbf16, #tpu.memory_space<vmem>>, vector<1x8x64xbf16>
    %325 = vector.shape_cast %324 : vector<1x8x64xbf16> to vector<8x64xbf16>
    %326 = arith.extf %325 : vector<8x64xbf16> to vector<8x64xf32>
    %327 = arith.mulf %326, %14 : vector<8x64xf32>
    %cst_105 = arith.constant dense<0.000000e+00> : vector<8xf32>
    %328 = vector.multi_reduction <add>, %327, %cst_105 [1] : vector<8x64xf32> to vector<8xf32>
    %329 = vector.shape_cast %328 : vector<8xf32> to vector<8x1xf32>
    %330 = arith.addf %329, %25 : vector<8x1xf32>
    %331 = arith.negf %330 : vector<8x1xf32>
    %332 = math.exp %331 : vector<8x1xf32>
    %cst_106 = arith.constant 1.000000e+00 : f32
    %333 = vector.broadcast %cst_106 : f32 to vector<8x1xf32>
    %334 = arith.addf %333, %332 : vector<8x1xf32>
    %335 = arith.divf %333, %334 : vector<8x1xf32>
    %336 = arith.addf %323, %335 : vector<8x1xf32>
    %cst_107 = arith.constant 0.000000e+00 : f32
    %337 = vector.broadcast %cst_107 : f32 to vector<8x1xf32>
    %c0_108 = arith.constant 0 : index
    %c0_109 = arith.constant 0 : index
    %c0_110 = arith.constant 0 : index
    %338 = vector.load %arg5[%c0_108, %c0_109, %c0_110] : memref<5x8x64xbf16, #tpu.memory_space<vmem>>, vector<1x8x64xbf16>
    %339 = vector.shape_cast %338 : vector<1x8x64xbf16> to vector<8x64xbf16>
    %c0_111 = arith.constant 0 : index
    %c0_112 = arith.constant 0 : index
    %340 = vector.load %arg10[%c0_111, %c0_112] : memref<64x64xbf16, #tpu.memory_space<vmem>>, vector<64x64xbf16>
    %cst_113 = arith.constant dense<0.000000e+00> : vector<8x64xf32>
    %341 = tpu.matmul %339, %340, %cst_113 {dimension_numbers = #tpu.dot_dimension_numbers<[1], [0], [0], [1], [0, 0, 1, 1], [], []>} : vector<8x64xbf16>, vector<64x64xbf16>, vector<8x64xf32> -> vector<8x64xf32>
    %342 = arith.addf %341, %9 : vector<8x64xf32>
    %c0_114 = arith.constant 0 : index
    %c0_115 = arith.constant 0 : index
    %c0_116 = arith.constant 0 : index
    %343 = vector.load %arg6[%c0_114, %c0_115, %c0_116] : memref<5x8x64xbf16, #tpu.memory_space<vmem>>, vector<1x8x64xbf16>
    %344 = vector.shape_cast %343 : vector<1x8x64xbf16> to vector<8x64xbf16>
    %345 = arith.extf %344 : vector<8x64xbf16> to vector<8x64xf32>
    %346 = arith.mulf %345, %342 : vector<8x64xf32>
    %cst_117 = arith.constant dense<0.000000e+00> : vector<8xf32>
    %347 = vector.multi_reduction <add>, %346, %cst_117 [1] : vector<8x64xf32> to vector<8xf32>
    %348 = vector.shape_cast %347 : vector<8xf32> to vector<8x1xf32>
    %349 = arith.negf %348 : vector<8x1xf32>
    %350 = math.exp %349 : vector<8x1xf32>
    %cst_118 = arith.constant 1.000000e+00 : f32
    %351 = vector.broadcast %cst_118 : f32 to vector<8x1xf32>
    %352 = arith.addf %351, %350 : vector<8x1xf32>
    %353 = arith.divf %351, %352 : vector<8x1xf32>
    %354 = arith.addf %337, %353 : vector<8x1xf32>
    %c1_119 = arith.constant 1 : index
    %c0_120 = arith.constant 0 : index
    %c0_121 = arith.constant 0 : index
    %355 = vector.load %arg5[%c1_119, %c0_120, %c0_121] : memref<5x8x64xbf16, #tpu.memory_space<vmem>>, vector<1x8x64xbf16>
    %356 = vector.shape_cast %355 : vector<1x8x64xbf16> to vector<8x64xbf16>
    %c0_122 = arith.constant 0 : index
    %c0_123 = arith.constant 0 : index
    %357 = vector.load %arg10[%c0_122, %c0_123] : memref<64x64xbf16, #tpu.memory_space<vmem>>, vector<64x64xbf16>
    %cst_124 = arith.constant dense<0.000000e+00> : vector<8x64xf32>
    %358 = tpu.matmul %356, %357, %cst_124 {dimension_numbers = #tpu.dot_dimension_numbers<[1], [0], [0], [1], [0, 0, 1, 1], [], []>} : vector<8x64xbf16>, vector<64x64xbf16>, vector<8x64xf32> -> vector<8x64xf32>
    %359 = arith.addf %358, %9 : vector<8x64xf32>
    %c1_125 = arith.constant 1 : index
    %c0_126 = arith.constant 0 : index
    %c0_127 = arith.constant 0 : index
    %360 = vector.load %arg6[%c1_125, %c0_126, %c0_127] : memref<5x8x64xbf16, #tpu.memory_space<vmem>>, vector<1x8x64xbf16>
    %361 = vector.shape_cast %360 : vector<1x8x64xbf16> to vector<8x64xbf16>
    %362 = arith.extf %361 : vector<8x64xbf16> to vector<8x64xf32>
    %363 = arith.mulf %362, %359 : vector<8x64xf32>
    %cst_128 = arith.constant dense<0.000000e+00> : vector<8xf32>
    %364 = vector.multi_reduction <add>, %363, %cst_128 [1] : vector<8x64xf32> to vector<8xf32>
    %365 = vector.shape_cast %364 : vector<8xf32> to vector<8x1xf32>
    %366 = arith.negf %365 : vector<8x1xf32>
    %367 = math.exp %366 : vector<8x1xf32>
    %cst_129 = arith.constant 1.000000e+00 : f32
    %368 = vector.broadcast %cst_129 : f32 to vector<8x1xf32>
    %369 = arith.addf %368, %367 : vector<8x1xf32>
    %370 = arith.divf %368, %369 : vector<8x1xf32>
    %371 = arith.addf %354, %370 : vector<8x1xf32>
    %c2_130 = arith.constant 2 : index
    %c0_131 = arith.constant 0 : index
    %c0_132 = arith.constant 0 : index
    %372 = vector.load %arg5[%c2_130, %c0_131, %c0_132] : memref<5x8x64xbf16, #tpu.memory_space<vmem>>, vector<1x8x64xbf16>
    %373 = vector.shape_cast %372 : vector<1x8x64xbf16> to vector<8x64xbf16>
    %c0_133 = arith.constant 0 : index
    %c0_134 = arith.constant 0 : index
    %374 = vector.load %arg10[%c0_133, %c0_134] : memref<64x64xbf16, #tpu.memory_space<vmem>>, vector<64x64xbf16>
    %cst_135 = arith.constant dense<0.000000e+00> : vector<8x64xf32>
    %375 = tpu.matmul %373, %374, %cst_135 {dimension_numbers = #tpu.dot_dimension_numbers<[1], [0], [0], [1], [0, 0, 1, 1], [], []>} : vector<8x64xbf16>, vector<64x64xbf16>, vector<8x64xf32> -> vector<8x64xf32>
    %376 = arith.addf %375, %9 : vector<8x64xf32>
    %c2_136 = arith.constant 2 : index
    %c0_137 = arith.constant 0 : index
    %c0_138 = arith.constant 0 : index
    %377 = vector.load %arg6[%c2_136, %c0_137, %c0_138] : memref<5x8x64xbf16, #tpu.memory_space<vmem>>, vector<1x8x64xbf16>
    %378 = vector.shape_cast %377 : vector<1x8x64xbf16> to vector<8x64xbf16>
    %379 = arith.extf %378 : vector<8x64xbf16> to vector<8x64xf32>
    %380 = arith.mulf %379, %376 : vector<8x64xf32>
    %cst_139 = arith.constant dense<0.000000e+00> : vector<8xf32>
    %381 = vector.multi_reduction <add>, %380, %cst_139 [1] : vector<8x64xf32> to vector<8xf32>
    %382 = vector.shape_cast %381 : vector<8xf32> to vector<8x1xf32>
    %383 = arith.negf %382 : vector<8x1xf32>
    %384 = math.exp %383 : vector<8x1xf32>
    %cst_140 = arith.constant 1.000000e+00 : f32
    %385 = vector.broadcast %cst_140 : f32 to vector<8x1xf32>
    %386 = arith.addf %385, %384 : vector<8x1xf32>
    %387 = arith.divf %385, %386 : vector<8x1xf32>
    %388 = arith.addf %371, %387 : vector<8x1xf32>
    %c3_141 = arith.constant 3 : index
    %c0_142 = arith.constant 0 : index
    %c0_143 = arith.constant 0 : index
    %389 = vector.load %arg5[%c3_141, %c0_142, %c0_143] : memref<5x8x64xbf16, #tpu.memory_space<vmem>>, vector<1x8x64xbf16>
    %390 = vector.shape_cast %389 : vector<1x8x64xbf16> to vector<8x64xbf16>
    %c0_144 = arith.constant 0 : index
    %c0_145 = arith.constant 0 : index
    %391 = vector.load %arg10[%c0_144, %c0_145] : memref<64x64xbf16, #tpu.memory_space<vmem>>, vector<64x64xbf16>
    %cst_146 = arith.constant dense<0.000000e+00> : vector<8x64xf32>
    %392 = tpu.matmul %390, %391, %cst_146 {dimension_numbers = #tpu.dot_dimension_numbers<[1], [0], [0], [1], [0, 0, 1, 1], [], []>} : vector<8x64xbf16>, vector<64x64xbf16>, vector<8x64xf32> -> vector<8x64xf32>
    %393 = arith.addf %392, %9 : vector<8x64xf32>
    %c3_147 = arith.constant 3 : index
    %c0_148 = arith.constant 0 : index
    %c0_149 = arith.constant 0 : index
    %394 = vector.load %arg6[%c3_147, %c0_148, %c0_149] : memref<5x8x64xbf16, #tpu.memory_space<vmem>>, vector<1x8x64xbf16>
    %395 = vector.shape_cast %394 : vector<1x8x64xbf16> to vector<8x64xbf16>
    %396 = arith.extf %395 : vector<8x64xbf16> to vector<8x64xf32>
    %397 = arith.mulf %396, %393 : vector<8x64xf32>
    %cst_150 = arith.constant dense<0.000000e+00> : vector<8xf32>
    %398 = vector.multi_reduction <add>, %397, %cst_150 [1] : vector<8x64xf32> to vector<8xf32>
    %399 = vector.shape_cast %398 : vector<8xf32> to vector<8x1xf32>
    %400 = arith.negf %399 : vector<8x1xf32>
    %401 = math.exp %400 : vector<8x1xf32>
    %cst_151 = arith.constant 1.000000e+00 : f32
    %402 = vector.broadcast %cst_151 : f32 to vector<8x1xf32>
    %403 = arith.addf %402, %401 : vector<8x1xf32>
    %404 = arith.divf %402, %403 : vector<8x1xf32>
    %405 = arith.addf %388, %404 : vector<8x1xf32>
    %c4_152 = arith.constant 4 : index
    %c0_153 = arith.constant 0 : index
    %c0_154 = arith.constant 0 : index
    %406 = vector.load %arg5[%c4_152, %c0_153, %c0_154] : memref<5x8x64xbf16, #tpu.memory_space<vmem>>, vector<1x8x64xbf16>
    %407 = vector.shape_cast %406 : vector<1x8x64xbf16> to vector<8x64xbf16>
    %c0_155 = arith.constant 0 : index
    %c0_156 = arith.constant 0 : index
    %408 = vector.load %arg10[%c0_155, %c0_156] : memref<64x64xbf16, #tpu.memory_space<vmem>>, vector<64x64xbf16>
    %cst_157 = arith.constant dense<0.000000e+00> : vector<8x64xf32>
    %409 = tpu.matmul %407, %408, %cst_157 {dimension_numbers = #tpu.dot_dimension_numbers<[1], [0], [0], [1], [0, 0, 1, 1], [], []>} : vector<8x64xbf16>, vector<64x64xbf16>, vector<8x64xf32> -> vector<8x64xf32>
    %410 = arith.addf %409, %9 : vector<8x64xf32>
    %c4_158 = arith.constant 4 : index
    %c0_159 = arith.constant 0 : index
    %c0_160 = arith.constant 0 : index
    %411 = vector.load %arg6[%c4_158, %c0_159, %c0_160] : memref<5x8x64xbf16, #tpu.memory_space<vmem>>, vector<1x8x64xbf16>
    %412 = vector.shape_cast %411 : vector<1x8x64xbf16> to vector<8x64xbf16>
    %413 = arith.extf %412 : vector<8x64xbf16> to vector<8x64xf32>
    %414 = arith.mulf %413, %410 : vector<8x64xf32>
    %cst_161 = arith.constant dense<0.000000e+00> : vector<8xf32>
    %415 = vector.multi_reduction <add>, %414, %cst_161 [1] : vector<8x64xf32> to vector<8xf32>
    %416 = vector.shape_cast %415 : vector<8xf32> to vector<8x1xf32>
    %417 = arith.negf %416 : vector<8x1xf32>
    %418 = math.exp %417 : vector<8x1xf32>
    %cst_162 = arith.constant 1.000000e+00 : f32
    %419 = vector.broadcast %cst_162 : f32 to vector<8x1xf32>
    %420 = arith.addf %419, %418 : vector<8x1xf32>
    %421 = arith.divf %419, %420 : vector<8x1xf32>
    %422 = arith.addf %405, %421 : vector<8x1xf32>
    %c0_163 = arith.constant 0 : index
    %423 = memref.load %arg11[%c0_163] : memref<5xf32, #tpu.memory_space<smem>>
    %c1_164 = arith.constant 1 : index
    %424 = memref.load %arg11[%c1_164] : memref<5xf32, #tpu.memory_space<smem>>
    %c2_165 = arith.constant 2 : index
    %425 = memref.load %arg11[%c2_165] : memref<5xf32, #tpu.memory_space<smem>>
    %c3_166 = arith.constant 3 : index
    %426 = memref.load %arg11[%c3_166] : memref<5xf32, #tpu.memory_space<smem>>
    %c4_167 = arith.constant 4 : index
    %427 = memref.load %arg11[%c4_167] : memref<5xf32, #tpu.memory_space<smem>>
    %428 = vector.broadcast %423 : f32 to vector<8x1xf32>
    %429 = arith.mulf %428, %250 : vector<8x1xf32>
    %430 = arith.subf %22, %429 : vector<8x1xf32>
    %cst_168 = arith.constant 0.000000e+00 : f32
    %431 = vector.broadcast %cst_168 : f32 to vector<8x1xf32>
    %432 = arith.subf %431, %430 : vector<8x1xf32>
    %433 = vector.broadcast %425 : f32 to vector<8x1xf32>
    %434 = arith.mulf %433, %422 : vector<8x1xf32>
    %435 = arith.subf %336, %434 : vector<8x1xf32>
    %436 = vector.broadcast %424 : f32 to vector<8x1xf32>
    %437 = arith.mulf %436, %435 : vector<8x1xf32>
    %438 = arith.subf %432, %437 : vector<8x1xf32>
    %439 = arith.addf %22, %250 : vector<8x1xf32>
    %cst_169 = arith.constant 1.000000e+00 : f32
    %440 = vector.broadcast %cst_169 : f32 to vector<8x1xf32>
    %441 = arith.subf %439, %440 : vector<8x1xf32>
    %442 = math.absf %441 : vector<8x1xf32>
    %443 = vector.broadcast %426 : f32 to vector<8x1xf32>
    %444 = arith.mulf %443, %442 : vector<8x1xf32>
    %445 = arith.addf %438, %444 : vector<8x1xf32>
    %446 = arith.subf %22, %257 : vector<8x1xf32>
    %447 = math.absf %446 : vector<8x1xf32>
    %448 = vector.broadcast %427 : f32 to vector<8x1xf32>
    %449 = arith.mulf %448, %447 : vector<8x1xf32>
    %450 = arith.addf %445, %449 : vector<8x1xf32>
    %c0_170 = arith.constant 0 : index
    %c0_171 = arith.constant 0 : index
    %451 = vector.load %arg12[%c0_170, %c0_171] : memref<8x1xf32, #tpu.memory_space<vmem>>, vector<8x1xf32>
    tpu.vector_store %arg12[%c0_170, %c0_171], %450 {strides = array<i32>} : memref<8x1xf32, #tpu.memory_space<vmem>>, vector<8x1xf32>,
    return
  }
  func.func @transform_0(%arg0: i32) -> (i32, i32) {
    %c0_i32 = arith.constant 0 : i32
    %c0_i32_0 = arith.constant 0 : i32
    return %arg0, %c0_i32 : i32, i32
  }
  func.func @transform_1(%arg0: i32) -> (i32, i32) {
    %c0_i32 = arith.constant 0 : i32
    %c0_i32_0 = arith.constant 0 : i32
    return %arg0, %c0_i32 : i32, i32
  }
  func.func @transform_2(%arg0: i32) -> (i32, i32, i32) {
    %c0_i32 = arith.constant 0 : i32
    %c0_i32_0 = arith.constant 0 : i32
    %c0_i32_1 = arith.constant 0 : i32
    return %c0_i32, %arg0, %c0_i32_0 : i32, i32, i32
  }
  func.func @transform_3(%arg0: i32) -> (i32, i32, i32) {
    %c0_i32 = arith.constant 0 : i32
    %c0_i32_0 = arith.constant 0 : i32
    %c0_i32_1 = arith.constant 0 : i32
    return %c0_i32, %arg0, %c0_i32_0 : i32, i32, i32
  }
  func.func @transform_4(%arg0: i32) -> (i32, i32, i32) {
    %c0_i32 = arith.constant 0 : i32
    %c0_i32_0 = arith.constant 0 : i32
    %c0_i32_1 = arith.constant 0 : i32
    return %c0_i32, %arg0, %c0_i32_0 : i32, i32, i32
  }
  func.func @transform_5(%arg0: i32) -> (i32, i32, i32) {
    %c0_i32 = arith.constant 0 : i32
    %c0_i32_0 = arith.constant 0 : i32
    %c0_i32_1 = arith.constant 0 : i32
    return %c0_i32, %arg0, %c0_i32_0 : i32, i32, i32
  }
  func.func @transform_6(%arg0: i32) -> (i32, i32) {
    %c0_i32 = arith.constant 0 : i32
    %c0_i32_0 = arith.constant 0 : i32
    %c0_i32_1 = arith.constant 0 : i32
    return %c0_i32, %c0_i32_0 : i32, i32
  }
  func.func @transform_7(%arg0: i32) -> (i32, i32) {
    %c0_i32 = arith.constant 0 : i32
    %c0_i32_0 = arith.constant 0 : i32
    %c0_i32_1 = arith.constant 0 : i32
    return %c0_i32, %c0_i32_0 : i32, i32
  }
  func.func @transform_8(%arg0: i32) -> (i32, i32) {
    %c0_i32 = arith.constant 0 : i32
    %c0_i32_0 = arith.constant 0 : i32
    %c0_i32_1 = arith.constant 0 : i32
    return %c0_i32, %c0_i32_0 : i32, i32
  }
  func.func @transform_9(%arg0: i32) -> (i32, i32) {
    %c0_i32 = arith.constant 0 : i32
    %c0_i32_0 = arith.constant 0 : i32
    %c0_i32_1 = arith.constant 0 : i32
    return %c0_i32, %c0_i32_0 : i32, i32
  }
  func.func @transform_10(%arg0: i32) -> i32 {
    %c0_i32 = arith.constant 0 : i32
    %c0_i32_0 = arith.constant 0 : i32
    return %c0_i32 : i32
  }
  func.func @transform_11(%arg0: i32) -> (i32, i32) {
    %c0_i32 = arith.constant 0 : i32
    %c0_i32_0 = arith.constant 0 : i32
    return %arg0, %c0_i32 : i32, i32
  }
}

</mosaic_0001>

<bundles_post_ra>
// kernel: tpu_custom_call.1
= control target key start
LH: loop header
LB: loop body
LE: loop exit
PB: predicated region body
PF: predicated region fallthrough
CT: control target
= control target key end

     0   :  { %16 = vsyncpa [#allocation3], 0  ;;  %s2997_s0 = inlined_call_operand.hbm [shape: bf16[8,768], index: 0, kind: input, shape index: {}]   ;;  %s2998_s1 = inlined_call_operand.hbm [shape: bf16[8,64], index: 1, kind: input, shape index: {}]   ;;  %s2999_s2 = inlined_call_operand.hbm [shape: bf16[10,8,64], index: 2, kind: input, shape index: {}]   ;;  %s3000_s3 = inlined_call_operand.hbm [shape: bf16[6,8,64], index: 3, kind: input, shape index: {}]   ;;  %s3001_s4 = inlined_call_operand.hbm [shape: bf16[5,8,64], index: 4, kind: input, shape index: {}]   ;;  %s3002_s5 = inlined_call_operand.hbm [shape: bf16[5,8,64], index: 5, kind: input, shape index: {}]   ;;  %s3003_s6 = inlined_call_operand.hbm [shape: bf16[768,256], index: 6, kind: input, shape index: {}]   ;;  %s3004_s7 = inlined_call_operand.vmem [shape: f32[1,256], index: 7, kind: input, shape index: {}]   ;;  %s3005_s8 = inlined_call_operand.hbm [shape: bf16[64,128], index: 8, kind: input, shape index: {}]   ;;  %s3006_s9 = inlined_call_operand.vmem [shape: bf16[64,64], index: 9, kind: input, shape index: {}]   ;;  %s3007_s10 = inlined_call_operand.vmem [shape: f32[5], index: 10, kind: input, shape index: {}]   ;;  %s3008_s11 = inlined_call_operand.vmem [shape: f32[8,1], index: 11, kind: output, shape index: {}]  }
   0x1   :  { %17 = vsyncpa [#allocation6], 0 }
   0x2   :  { %18 = vsyncpa [#allocation9], 0 }
   0x3   :  { %19 = vsyncpa [#allocation12], 0 }
   0x4   :  { %20 = vsyncpa [#allocation15], 0 }
   0x5   :  { %21 = vsyncpa [#allocation4], 0  ;;  %s2480_s17 = smov [#allocation5]   ;;  %s2280_s21 = scalar_lea.hbm %s2998_s1, 64 }
   0x6   :  { %s38_s18 = sshll.u32 %s2480_s17, 4  ;;  %p2281_p0 = scmp.ne.s32.totalorder %s2998_s1, %s2280_s21  ;;  %s39_s18 = int_to_ptr.vmem [resolvable:$true] %s38_s18 }
   0x7   :  { %p2284_p1 = scmp.lt.u32.totalorder %s2280_s21, %s2998_s1 }
   0x9   :  { %p2286_p2 = pnand %p2284_p1, %p2281_p0 }
   0xb   :  { %2289 = shalt.err (!%p2286_p2)
}
   0xc   :  { %s2290_s26 = scalar_lea.vmem %s39_s18, 64  ;;  %p2295_p4 = scmp.lt.s32.totalorder %s39_s18, %s39_s18 }
   0xd   :  { %p2291_p3 = scmp.ne.s32.totalorder %s39_s18, %s2290_s26  ;;  %p2296_p5 = scmp.lt.s32.totalorder %s2290_s26, %s2290_s26 }
   0xf   :  { %p2297_p6 = por %p2296_p5, %p2295_p4 }
  0x11   :  { %p2298_p7 = pnand %p2297_p6, %p2291_p3 }
  0x13   :  { %2301 = shalt.err (!%p2298_p7)
}
  0x14   :  { %41 = dma.hbm_to_vmem [thread:$0]  %s2998_s1, 64, %s39_s18, [#allocation6]  }
  0x15   :  { %s2481_s29 = smov [#allocation8]   ;;  %s2482_s12 = smov [#allocation11]  }
  0x16   :  { %s59_s30 = sshll.u32 %s2481_s29, 4  ;;  %s83_s13 = sshll.u32 %s2482_s12, 4  ;;  %s60_s30 = int_to_ptr.vmem [resolvable:$true] %s59_s30  ;;  %s84_s13 = int_to_ptr.vmem [resolvable:$true] %s83_s13 }
  0x17   :  { %s2302_s16 = scalar_lea.hbm %s3000_s3, 384 }
  0x18   :  { %p2303_p8 = scmp.ne.s32.totalorder %s3000_s3, %s2302_s16  ;;  %p2306_p9 = scmp.lt.u32.totalorder %s2302_s16, %s3000_s3 }
  0x1a   :  { %p2308_p10 = pnand %p2306_p9, %p2303_p8 }
  0x1c   :  { %2311 = shalt.err (!%p2308_p10)
}
  0x1d   :  { %s2312_s1 = scalar_lea.vmem %s60_s30, 384  ;;  %p2317_p12 = scmp.lt.s32.totalorder %s60_s30, %s60_s30 }
  0x1e   :  { %p2313_p11 = scmp.ne.s32.totalorder %s60_s30, %s2312_s1  ;;  %p2318_p13 = scmp.lt.s32.totalorder %s2312_s1, %s2312_s1 }
  0x20   :  { %p2319_p0 = por %p2318_p13, %p2317_p12 }
  0x22   :  { %p2320_p1 = pnand %p2319_p0, %p2313_p11 }
  0x24   :  { %2323 = shalt.err (!%p2320_p1)
}
  0x25   :  { %s2483_s18 = smov 64   ;;  %s2484_s22 = smov 4  }
  0x26   :  { %65 = dma.hbm_to_vmem [thread:$0]  %s3000_s3, 384, %s60_s30, [#allocation9], %s2483_s18, %s2483_s18, %s2484_s22  }
  0x27   :  { %s2324_s27 = scalar_lea.hbm %s3002_s5, 320 }
  0x28   :  { %p2325_p2 = scmp.ne.s32.totalorder %s3002_s5, %s2324_s27  ;;  %p2328_p3 = scmp.lt.u32.totalorder %s2324_s27, %s3002_s5 }
  0x2a   :  { %p2330_p4 = pnand %p2328_p3, %p2325_p2 }
  0x2c   :  { %2333 = shalt.err (!%p2330_p4)
}
  0x2d   :  { %s2334_s15 = scalar_lea.vmem %s84_s13, 320  ;;  %p2339_p6 = scmp.lt.s32.totalorder %s84_s13, %s84_s13 }
  0x2e   :  { %p2335_p5 = scmp.ne.s32.totalorder %s84_s13, %s2334_s15  ;;  %p2340_p7 = scmp.lt.s32.totalorder %s2334_s15, %s2334_s15 }
  0x30   :  { %p2341_p8 = por %p2340_p7, %p2339_p6 }
  0x32   :  { %p2342_p9 = pnand %p2341_p8, %p2335_p5 }
  0x34   :  { %2345 = shalt.err (!%p2342_p9)
}
  0x35   :  { %89 = dma.hbm_to_vmem [thread:$0]  %s3002_s5, 320, %s84_s13, [#allocation12], %s2483_s18, %s2483_s18, %s2484_s22  }
  0x36   :  { %s2485_s16 = smov [#allocation2]   ;;  %s2486_s19 = smov [#allocation7]  }
  0x37   :  { %s28_s17 = sshll.u32 %s2485_s16, 4  ;;  %s47_s20 = sshll.u32 %s2486_s19, 4  ;;  %s29_s17 = int_to_ptr.vmem [resolvable:$true] %s28_s17  ;;  %s48_s20 = int_to_ptr.vmem [resolvable:$true] %s47_s20 }
  0x38   :  { %s2346_s23 = scalar_lea.hbm %s2997_s0, 384 }
  0x39   :  { %p2347_p10 = scmp.ne.s32.totalorder %s2997_s0, %s2346_s23  ;;  %p2350_p11 = scmp.lt.u32.totalorder %s2346_s23, %s2997_s0 }
  0x3b   :  { %p2352_p12 = pnand %p2350_p11, %p2347_p10 }
  0x3d   :  { %2355 = shalt.err (!%p2352_p12)
}
  0x3e   :  { %s2356_s5 = scalar_lea.vmem %s29_s17, 384  ;;  %p2361_p0 = scmp.lt.s32.totalorder %s29_s17, %s29_s17 }
  0x3f   :  { %p2357_p13 = scmp.ne.s32.totalorder %s29_s17, %s2356_s5  ;;  %p2362_p1 = scmp.lt.s32.totalorder %s2356_s5, %s2356_s5 }
  0x41   :  { %p2363_p2 = por %p2362_p1, %p2361_p0 }
  0x43   :  { %p2364_p3 = pnand %p2363_p2, %p2357_p13 }
  0x45   :  { %2367 = shalt.err (!%p2364_p3)
}
  0x46   :  { %31 = dma.hbm_to_vmem [thread:$0]  %s2997_s0, 384, %s29_s17, [#allocation3]  }
  0x47   :  { %s2368_s14 = scalar_lea.hbm %s2999_s2, 640 }
  0x48   :  { %p2369_p4 = scmp.ne.s32.totalorder %s2999_s2, %s2368_s14  ;;  %p2372_p5 = scmp.lt.u32.totalorder %s2368_s14, %s2999_s2 }
  0x4a   :  { %p2374_p6 = pnand %p2372_p5, %p2369_p4 }
  0x4c   :  { %2377 = shalt.err (!%p2374_p6)
}
  0x4d   :  { %s2378_s19 = scalar_lea.vmem %s48_s20, 640  ;;  %p2383_p8 = scmp.lt.s32.totalorder %s48_s20, %s48_s20 }
  0x4e   :  { %p2379_p7 = scmp.ne.s32.totalorder %s48_s20, %s2378_s19  ;;  %p2384_p9 = scmp.lt.s32.totalorder %s2378_s19, %s2378_s19 }
  0x50   :  { %p2385_p10 = por %p2384_p9, %p2383_p8 }
  0x52   :  { %p2386_p11 = pnand %p2385_p10, %p2379_p7 }
  0x54   :  { %2389 = shalt.err (!%p2386_p11)
}
  0x55   :  { %53 = dma.hbm_to_vmem [thread:$0]  %s2999_s2, 640, %s48_s20, [#allocation6], %s2483_s18, %s2483_s18, %s2484_s22  }
  0x56   :  { %s2487_s21 = smov [#allocation10]   ;;  %s2488_s23 = smov [#allocation13]  }
  0x57   :  { %s71_s1 = sshll.u32 %s2487_s21, 4  ;;  %s95_s24 = sshll.u32 %s2488_s23, 4  ;;  %s72_s1 = int_to_ptr.vmem [resolvable:$true] %s71_s1  ;;  %s96_s24 = int_to_ptr.vmem [resolvable:$true] %s95_s24 }
  0x58   :  { %s2390_s27 = scalar_lea.hbm %s3001_s4, 320 }
  0x59   :  { %p2391_p12 = scmp.ne.s32.totalorder %s3001_s4, %s2390_s27  ;;  %p2394_p13 = scmp.lt.u32.totalorder %s2390_s27, %s3001_s4 }
  0x5b   :  { %p2396_p0 = pnand %p2394_p13, %p2391_p12 }
  0x5d   :  { %2399 = shalt.err (!%p2396_p0)
}
  0x5e   :  { %s2400_s2 = scalar_lea.vmem %s72_s1, 320  ;;  %p2405_p2 = scmp.lt.s32.totalorder %s72_s1, %s72_s1 }
  0x5f   :  { %p2401_p1 = scmp.ne.s32.totalorder %s72_s1, %s2400_s2  ;;  %p2406_p3 = scmp.lt.s32.totalorder %s2400_s2, %s2400_s2 }
  0x61   :  { %p2407_p4 = por %p2406_p3, %p2405_p2 }
  0x63   :  { %p2408_p5 = pnand %p2407_p4, %p2401_p1 }
  0x65   :  { %2411 = shalt.err (!%p2408_p5)
}
  0x66   :  { %77 = dma.hbm_to_vmem [thread:$0]  %s3001_s4, 320, %s72_s1, [#allocation9], %s2483_s18, %s2483_s18, %s2484_s22  }
  0x67   :  { %s2412_s3 = scalar_lea.hbm %s3003_s6, 12288 }
  0x68   :  { %p2413_p6 = scmp.ne.s32.totalorder %s3003_s6, %s2412_s3  ;;  %p2416_p7 = scmp.lt.u32.totalorder %s2412_s3, %s3003_s6 }
  0x6a   :  { %p2418_p8 = pnand %p2416_p7, %p2413_p6 }
  0x6c   :  { %2421 = shalt.err (!%p2418_p8)
}
  0x6d   :  { %s2422_s17 = scalar_lea.vmem %s96_s24, 12288  ;;  %p2427_p10 = scmp.lt.s32.totalorder %s96_s24, %s96_s24 }
  0x6e   :  { %p2423_p9 = scmp.ne.s32.totalorder %s96_s24, %s2422_s17  ;;  %p2428_p11 = scmp.lt.s32.totalorder %s2422_s17, %s2422_s17 }
  0x70   :  { %p2429_p12 = por %p2428_p11, %p2427_p10 }
  0x72   :  { %p2430_p13 = pnand %p2429_p12, %p2423_p9 }
  0x74   :  { %2433 = shalt.err (!%p2430_p13)
}
  0x75   :  { %s2489_s4 = smov 128   ;;  %s2490_s21 = smov 8  }
  0x76   :  { %101 = dma.hbm_to_vmem [thread:$0]  %s3003_s6, 12288, %s96_s24, [#allocation12], %s2489_s4, %s2489_s4, %s2490_s21  }
  0x77   :  { %s2491_s25 = smov [#allocation14]   ;;  %s124_s13 = sshll.u32 %s3007_s10, 4  ;;  %s125_s13 = int_to_ptr.vmem [resolvable:$true] %s124_s13 }
  0x78   :  { %s109_s26 = sshll.u32 %s2491_s25, 4  ;;  %s2434_s2 = scalar_lea.hbm %s3005_s8, 512  ;;  %s110_s26 = int_to_ptr.vmem [resolvable:$true] %s109_s26 }
  0x79   :  { %p2435_p0 = scmp.ne.s32.totalorder %s3005_s8, %s2434_s2  ;;  %p2438_p1 = scmp.lt.u32.totalorder %s2434_s2, %s3005_s8 }
  0x7b   :  { %p2440_p2 = pnand %p2438_p1, %p2435_p0 }
  0x7d   :  { %2443 = shalt.err (!%p2440_p2)
}
  0x7e   :  { %s2444_s6 = scalar_lea.vmem %s110_s26, 512  ;;  %p2449_p4 = scmp.lt.s32.totalorder %s110_s26, %s110_s26 }
  0x7f   :  { %p2445_p3 = scmp.ne.s32.totalorder %s110_s26, %s2444_s6  ;;  %p2450_p5 = scmp.lt.s32.totalorder %s2444_s6, %s2444_s6 }
  0x81   :  { %p2451_p6 = por %p2450_p5, %p2449_p4 }
  0x83   :  { %p2452_p7 = pnand %p2451_p6, %p2445_p3 }
  0x85   :  { %2455 = shalt.err (!%p2452_p7)
}
  0x86   :  { %115 = dma.hbm_to_vmem [thread:$0]  %s3005_s8, 512, %s110_s26, [#allocation15], %s2483_s18, %s2483_s18, %s2484_s22  }
  0x87   :  { %s2456_s3 = scalar_lea.vmem %s125_s13, 16  ;;  %p2461_p9 = scmp.lt.s32.totalorder %s125_s13, %s125_s13 }
  0x88   :  { %p2457_p8 = scmp.ne.s32.totalorder %s125_s13, %s2456_s3  ;;  %p2462_p10 = scmp.lt.s32.totalorder %s2456_s3, %s2456_s3 }
  0x8a   :  { %p2463_p11 = por %p2462_p10, %p2461_p9 }
  0x8c   :  { %p2464_p12 = pnand %p2463_p11, %p2457_p8 }
  0x8e   :  { %2467 = shalt.err (!%p2464_p12)
}
  0x8f   :  { %s2492_s30 = smov [#allocation16]  }
  0x90   :  { %127 = dma.vmem_to_smem %s125_s13, 16, %s2492_s30, [#allocation4]  }
  0x91   :  { %2468 = dma.done.wait [#allocation3], 384  }
  0x92   :  { %2469 = vsyncadd [#allocation3], 4294966912 }
  0x93   :  { %2470 = dma.done.wait [#allocation6], 704  }
  0x94   :  { %2471 = vsyncadd [#allocation6], 4294966592 }
  0x95   :  { %2472 = dma.done.wait [#allocation9], 704  }
  0x96   :  { %2473 = vsyncadd [#allocation9], 4294966592 }
  0x97   :  { %2474 = dma.done.wait [#allocation12], 12608  }
  0x98   :  { %2475 = vsyncadd [#allocation12], 4294954688 }
  0x99   :  { %2476 = dma.done.wait [#allocation15], 512  }
  0x9a   :  { %2477 = vsyncadd [#allocation15], 4294966784 }
  0x9b   :  { %2478 = dma.done.wait [#allocation4], 16  }
  0x9c   :  { %2479 = vsyncadd [#allocation4], 4294967280 }
  0x9d   :  { %155 = sfence }
  0x9e   :  { %v1994_v0 = vld [vmem:[#allocation13 + $0x104] ss:$8 sps:$4 sm:$0xff]   ;;  %v1996_v1 = vld [vmem:[#allocation13 + $0x100] ss:$8 sps:$4 sm:$0xff]   ;;  %v1997_v2 = vld [vmem:[#allocation13 + $0x114] ss:$8 sps:$4 sm:$0xff]  }
  0x9f   :  { %810 = vmatprep.subr.bf16.mxu0 %v1994_v0  ;;  %v1999_v3 = vld [vmem:[#allocation13 + $0x110] ss:$8 sps:$4 sm:$0xff]   ;;  %v2000_v4 = vld [vmem:[#allocation13 + $0x124] ss:$8 sps:$4 sm:$0xff]   ;;  %v2002_v5 = vld [vmem:[#allocation13 + $0x120] ss:$8 sps:$4 sm:$0xff]  }
  0xa0   :  { %811 = vmatpush1.bf16.msra.mxu0 %v1996_v1  ;;  %v2003_v6 = vld [vmem:[#allocation13 + $0x134] ss:$8 sps:$4 sm:$0xff]   ;;  %v2005_v7 = vld [vmem:[#allocation13 + $0x130] ss:$8 sps:$4 sm:$0xff]   ;;  %v2006_v8 = vld [vmem:[#allocation13 + $0x144] ss:$8 sps:$4 sm:$0xff]  }
  0xa1   :  { %812 = vmatprep.subr.bf16.mxu0 %v1997_v2  ;;  %v2008_v9 = vld [vmem:[#allocation13 + $0x140] ss:$8 sps:$4 sm:$0xff]   ;;  %v2009_v10 = vld [vmem:[#allocation13 + $0x154] ss:$8 sps:$4 sm:$0xff]   ;;  %v2011_v11 = vld [vmem:[#allocation13 + $0x150] ss:$8 sps:$4 sm:$0xff]  }
  0xa2   :  { %v2012_v12 = vld [vmem:[#allocation13 + $0x164] ss:$8 sps:$4 sm:$0xff]   ;;  %v2041_v14 = vld [vmem:[#allocation13] ss:$8 sps:$4 sm:$0xff]   ;;  %v2015_v16 = vld [vmem:[#allocation13 + $0x174] ss:$8 sps:$4 sm:$0xff]  }
  0xa3   :  { %v2039_v13 = vld [vmem:[#allocation13 + $0x4] ss:$8 sps:$4 sm:$0xff]   ;;  %v2014_v15 = vld [vmem:[#allocation13 + $0x160] ss:$8 sps:$4 sm:$0xff]   ;;  %v2045_v17 = vld [vmem:[#allocation13 + $0x14] ss:$8 sps:$4 sm:$0xff]  }
  0xa4   :  { %813 = vmatpush1.bf16.msra.mxu0 %v1999_v3  ;;  %769 = vmatprep.subr.bf16.mxu1 %v2039_v13  ;;  %v2047_v18 = vld [vmem:[#allocation13 + $0x10] ss:$8 sps:$4 sm:$0xff]   ;;  %v2669_v19 = vld [vmem:[#allocation2 + $0x8] sm:$0xff]  ;;  %v2059_v25 = vld [vmem:[#allocation13 + $0x34] ss:$8 sps:$4 sm:$0xff]   ;;  %vm2494_vm0 = vmmov 0  }
  0xa5   :  { %814 = vmatprep.subr.bf16.mxu0 %v2000_v4  ;;  %770 = vmatpush1.bf16.msra.mxu1 %v2041_v14  ;;  %v1719_v20 = vcombine.high %v2669_v19, %v2669_v19  ;;  %v2017_v21 = vld [vmem:[#allocation13 + $0x170] ss:$8 sps:$4 sm:$0xff]   ;;  %v2053_v22 = vld [vmem:[#allocation13 + $0x24] ss:$8 sps:$4 sm:$0xff]   ;;  %v2055_v23 = vld [vmem:[#allocation13 + $0x20] ss:$8 sps:$4 sm:$0xff]   ;;  %v1718_v58 = vcombine.low %v2669_v19, %v2669_v19 }
  0xa6   :  { %771 = vmatprep.subr.bf16.mxu1 %v2045_v17  ;;  %v2018_v24 = vld [vmem:[#allocation13 + $0x184] ss:$8 sps:$4 sm:$0xff]   ;;  %v2020_v26 = vld [vmem:[#allocation13 + $0x180] ss:$8 sps:$4 sm:$0xff]   ;;  %v2021_v27 = vld [vmem:[#allocation13 + $0x194] ss:$8 sps:$4 sm:$0xff]  }
  0xa7   :  { %842 = vmatprep.mubr.bf16.mxu0 %v1719_v20  ;;  %v2061_v28 = vld [vmem:[#allocation13 + $0x30] ss:$8 sps:$4 sm:$0xff]   ;;  %v2065_v29 = vld [vmem:[#allocation13 + $0x44] ss:$8 sps:$4 sm:$0xff]   ;;  %v2067_v32 = vld [vmem:[#allocation13 + $0x40] ss:$8 sps:$4 sm:$0xff]  }
  0xa8   :  { %815 = vmatpush1.bf16.msra.mxu0 %v2002_v5  ;;  %v2023_v30 = vld [vmem:[#allocation13 + $0x190] ss:$8 sps:$4 sm:$0xff]   ;;  %v2024_v31 = vld [vmem:[#allocation13 + $0x1a4] ss:$8 sps:$4 sm:$0xff]   ;;  %v2071_v33 = vld [vmem:[#allocation13 + $0x54] ss:$8 sps:$4 sm:$0xff]  }
  0xa9   :  { %816 = vmatprep.subr.bf16.mxu0 %v2003_v6  ;;  %772 = vmatpush1.bf16.msra.mxu1 %v2047_v18  ;;  %v2026_v34 = vld [vmem:[#allocation13 + $0x1a0] ss:$8 sps:$4 sm:$0xff]   ;;  %v2027_v35 = vld [vmem:[#allocation13 + $0x1b4] ss:$8 sps:$4 sm:$0xff]   ;;  %v2073_v36 = vld [vmem:[#allocation13 + $0x50] ss:$8 sps:$4 sm:$0xff]  }
  0xaa   :  { %773 = vmatprep.subr.bf16.mxu1 %v2053_v22  ;;  %v2077_v37 = vld [vmem:[#allocation13 + $0x64] ss:$8 sps:$4 sm:$0xff]   ;;  %v2029_v38 = vld [vmem:[#allocation13 + $0x1b0] ss:$8 sps:$4 sm:$0xff]   ;;  %v2079_v40 = vld [vmem:[#allocation13 + $0x60] ss:$8 sps:$4 sm:$0xff]  }
  0xab   :  { %v2030_v39 = vld [vmem:[#allocation13 + $0x1c4] ss:$8 sps:$4 sm:$0xff]   ;;  %v2083_v41 = vld [vmem:[#allocation13 + $0x74] ss:$8 sps:$4 sm:$0xff]   ;;  %v2032_v42 = vld [vmem:[#allocation13 + $0x1c0] ss:$8 sps:$4 sm:$0xff]  }
  0xac   :  { %817 = vmatpush1.bf16.msra.mxu0 %v2005_v7  ;;  %v2033_v43 = vld [vmem:[#allocation13 + $0x1d4] ss:$8 sps:$4 sm:$0xff]   ;;  %v2085_v44 = vld [vmem:[#allocation13 + $0x70] ss:$8 sps:$4 sm:$0xff]   ;;  %v2089_v45 = vld [vmem:[#allocation13 + $0x84] ss:$8 sps:$4 sm:$0xff]  }
  0xad   :  { %818 = vmatprep.subr.bf16.mxu0 %v2006_v8  ;;  %774 = vmatpush1.bf16.msra.mxu1 %v2055_v23  ;;  %v2035_v46 = vld [vmem:[#allocation13 + $0x1d0] ss:$8 sps:$4 sm:$0xff]   ;;  %v2036_v47 = vld [vmem:[#allocation13 + $0x1e4] ss:$8 sps:$4 sm:$0xff]   ;;  %v2091_v48 = vld [vmem:[#allocation13 + $0x80] ss:$8 sps:$4 sm:$0xff]  }
  0xae   :  { %775 = vmatprep.subr.bf16.mxu1 %v2059_v25  ;;  %v2095_v49 = vld [vmem:[#allocation13 + $0x94] ss:$8 sps:$4 sm:$0xff]   ;;  %v2038_v50 = vld [vmem:[#allocation13 + $0x1e0] ss:$8 sps:$4 sm:$0xff]   ;;  %v2097_v52 = vld [vmem:[#allocation13 + $0x90] ss:$8 sps:$4 sm:$0xff]  }
  0xaf   :  { %v2042_v51 = vld [vmem:[#allocation13 + $0x1f4] ss:$8 sps:$4 sm:$0xff]   ;;  %v2101_v53 = vld [vmem:[#allocation13 + $0xa4] ss:$8 sps:$4 sm:$0xff]   ;;  %v2044_v54 = vld [vmem:[#allocation13 + $0x1f0] ss:$8 sps:$4 sm:$0xff]  }
  0xb0   :  { %819 = vmatpush1.bf16.msra.mxu0 %v2008_v9  ;;  %v2052_v55 = vld [vmem:[#allocation13 + $0x204] ss:$8 sps:$4 sm:$0xff]   ;;  %v2103_v56 = vld [vmem:[#allocation13 + $0xa0] ss:$8 sps:$4 sm:$0xff]   ;;  %v2107_v57 = vld [vmem:[#allocation13 + $0xb4] ss:$8 sps:$4 sm:$0xff]  }
  0xb1   :  { %820 = vmatprep.subr.bf16.mxu0 %v2009_v10  ;;  %776 = vmatpush1.bf16.msra.mxu1 %v2061_v28  ;;  %v2050_v59 = vld [vmem:[#allocation13 + $0x200] ss:$8 sps:$4 sm:$0xff]   ;;  %v2109_v60 = vld [vmem:[#allocation13 + $0xb0] ss:$8 sps:$4 sm:$0xff]   ;;  %v2058_v62 = vld [vmem:[#allocation13 + $0x214] ss:$8 sps:$4 sm:$0xff]  }
  0xb2   :  { %777 = vmatprep.subr.bf16.mxu1 %v2065_v29  ;;  %v157_v61 = vld [vmem:[#allocation2] sm:$0xff]  ;;  %v2113_v63 = vld [vmem:[#allocation13 + $0xc4] ss:$8 sps:$4 sm:$0xff]   ;;  %v2056_v2 = vld [vmem:[#allocation13 + $0x210] ss:$8 sps:$4 sm:$0xff]   ;;  %v2493_v22 = vmov 0.0  }
  0xb3   :  { %v1717_v0 = vcombine.high %v157_v61, %v157_v61  ;;  %v2675_v1 = vld [vmem:[#allocation2 + $0x10] sm:$0xff]  ;;  %v2115_v5 = vld [vmem:[#allocation13 + $0xc0] ss:$8 sps:$4 sm:$0xff]   ;;  %v2119_v6 = vld [vmem:[#allocation13 + $0xd4] ss:$8 sps:$4 sm:$0xff]   ;;  %v1716_v18 = vcombine.low %v157_v61, %v157_v61  ;;  %vm925_vm1 = vcmask 523264  }
  0xb4   :  { %821 = vmatpush1.bf16.msra.mxu0 %v2011_v11  ;;  %v1721_v3 = vcombine.high %v2675_v1, %v2675_v1  ;;  %v2064_v4 = vld [vmem:[#allocation13 + $0x224] ss:$8 sps:$4 sm:$0xff]   ;;  %v2062_v7 = vld [vmem:[#allocation13 + $0x220] ss:$8 sps:$4 sm:$0xff]   ;;  %v2070_v8 = vld [vmem:[#allocation13 + $0x234] ss:$8 sps:$4 sm:$0xff]  }
  0xb5   :  { %822 = vmatprep.subr.bf16.mxu0 %v2012_v12  ;;  %778 = vmatpush1.bf16.msra.mxu1 %v2067_v32  ;;  %v2121_v9 = vld [vmem:[#allocation13 + $0xd0] ss:$8 sps:$4 sm:$0xff]   ;;  %v2125_v10 = vld [vmem:[#allocation13 + $0xe4] ss:$8 sps:$4 sm:$0xff]   ;;  %v2127_v12 = vld [vmem:[#allocation13 + $0xe0] ss:$8 sps:$4 sm:$0xff]  }
  0xb6   :  { %779 = vmatprep.subr.bf16.mxu1 %v2071_v33  ;;  %801 = vmatprep.mubr.bf16.mxu1 %v1717_v0  ;;  %v2068_v11 = vld [vmem:[#allocation13 + $0x230] ss:$8 sps:$4 sm:$0xff]   ;;  %v2076_v13 = vld [vmem:[#allocation13 + $0x244] ss:$8 sps:$4 sm:$0xff]   ;;  %v2131_v14 = vld [vmem:[#allocation13 + $0xf4] ss:$8 sps:$4 sm:$0xff]   ;;  %v258_v0 = vlaneseq }
  0xb7   :  { %v2082_v17 = vld [vmem:[#allocation13 + $0x254] ss:$8 sps:$4 sm:$0xff]   ;;  %v2080_v19 = vld [vmem:[#allocation13 + $0x250] ss:$8 sps:$4 sm:$0xff]   ;;  %v2086_v23 = vld [vmem:[#allocation13 + $0x260] ss:$8 sps:$4 sm:$0xff]  }
  0xb8   :  { %823 = vmatpush1.bf16.msra.mxu0 %v2014_v15  ;;  %v2074_v15 = vld [vmem:[#allocation13 + $0x240] ss:$8 sps:$4 sm:$0xff]   ;;  %v2682_v20 = vld [vmem:[%s3006_s9] sm:$0xff]   ;;  %v2100_v28 = vld [vmem:[#allocation13 + $0x284] ss:$8 sps:$4 sm:$0xff]   ;;  %s1864_s23 = sld [smem:[#allocation16 + $0x1]] }
  0xb9   :  { %824 = vmatprep.subr.bf16.mxu0 %v2015_v16  ;;  %780 = vmatpush1.bf16.msra.mxu1 %v2073_v36  ;;  %v2133_v16 = vld [vmem:[#allocation13 + $0xf0] ss:$8 sps:$4 sm:$0xff]   ;;  %v2094_v25 = vld [vmem:[#allocation13 + $0x274] ss:$8 sps:$4 sm:$0xff]   ;;  %v2098_v29 = vld [vmem:[#allocation13 + $0x280] ss:$8 sps:$4 sm:$0xff]  }
  0xba   :  { %781 = vmatprep.subr.bf16.mxu1 %v2077_v37  ;;  %v2104_v32 = vld [vmem:[#allocation13 + $0x290] ss:$8 sps:$4 sm:$0xff]   ;;  %v2118_v36 = vld [vmem:[#allocation13 + $0x2b4] ss:$8 sps:$4 sm:$0xff]   ;;  %s1866_s25 = sld [smem:[#allocation16 + $0x3]]  ;;  %s1867_s26 = sld [smem:[#allocation16 + $0x4]] }
  0xbb   :  { %v1349_v33 = vld [vmem:[#allocation10] sm:$0xf]  ;;  %vm1704_vm2 = vcmask 7168  }
  0xbc   :  { %825 = vmatpush1.bf16.msra.mxu0 %v2017_v21  ;;  %v2088_v21 = vld [vmem:[#allocation13 + $0x264] ss:$8 sps:$4 sm:$0xff]   ;;  %v2116_v37 = vld [vmem:[#allocation13 + $0x2b0] ss:$8 sps:$4 sm:$0xff]  }
  0xbd   :  { %826 = vmatprep.subr.bf16.mxu0 %v2018_v24  ;;  %782 = vmatpush1.bf16.msra.mxu1 %v2079_v40  ;;  %v2689_v24 = vld [vmem:[%s3006_s9 + $0x8] sm:$0xff]  }
  0xbe   :  { %783 = vmatprep.subr.bf16.mxu1 %v2083_v41  ;;  %v2130_v40 = vld [vmem:[#allocation13 + $0x2d4] ss:$8 sps:$4 sm:$0xff]   ;;  %v2128_v41 = vld [vmem:[#allocation13 + $0x2d0] ss:$8 sps:$4 sm:$0xff]  }
  0xc0   :  { %827 = vmatpush1.bf16.msra.mxu0 %v2020_v26  ;;  %v2092_v26 = vld [vmem:[#allocation13 + $0x270] ss:$8 sps:$4 sm:$0xff]  }
  0xc1   :  { %828 = vmatprep.subr.bf16.mxu0 %v2021_v27  ;;  %784 = vmatpush1.bf16.msra.mxu1 %v2085_v44  ;;  %v2698_v27 = vld [vmem:[%s3006_s9 + $0x10] sm:$0xff]  }
  0xc2   :  { %785 = vmatprep.subr.bf16.mxu1 %v2089_v45  ;;  %v2134_v44 = vld [vmem:[#allocation13 + $0x2e0] ss:$8 sps:$4 sm:$0xff]   ;;  %v2141_v45 = vld [vmem:[#allocation13 + $0x2f4] ss:$8 sps:$4 sm:$0xff]  }
  0xc4   :  { %829 = vmatpush1.bf16.msra.mxu0 %v2023_v30  ;;  %v2705_v30 = vld [vmem:[%s3006_s9 + $0x18] sm:$0xff]  }
  0xc5   :  { %830 = vmatprep.subr.bf16.mxu0 %v2024_v31  ;;  %786 = vmatpush1.bf16.msra.mxu1 %v2091_v48  ;;  %v2106_v31 = vld [vmem:[#allocation13 + $0x294] ss:$8 sps:$4 sm:$0xff]   ;;  %v2144_v48 = vld [vmem:[#allocation14] sm:$0xff]  }
  0xc6   :  { %787 = vmatprep.subr.bf16.mxu1 %v2095_v49  ;;  %v2145_v49 = vld [vmem:[#allocation14 + $0x8] sm:$0xff]  }
  0xc8   :  { %831 = vmatpush1.bf16.msra.mxu0 %v2026_v34  ;;  %v2112_v34 = vld [vmem:[#allocation13 + $0x2a4] ss:$8 sps:$4 sm:$0xff]  }
  0xc9   :  { %832 = vmatprep.subr.bf16.mxu0 %v2027_v35  ;;  %788 = vmatpush1.bf16.msra.mxu1 %v2097_v52  ;;  %v2110_v35 = vld [vmem:[#allocation13 + $0x2a0] ss:$8 sps:$4 sm:$0xff]   ;;  %v2147_v52 = vld [vmem:[#allocation14 + $0x18] sm:$0xff]  }
  0xca   :  { %789 = vmatprep.subr.bf16.mxu1 %v2101_v53  ;;  %v892_v53 = vld [vmem:[#allocation5] sm:$0xf] }
  0xcc   :  { %833 = vmatpush1.bf16.msra.mxu0 %v2029_v38  ;;  %v2124_v38 = vld [vmem:[#allocation13 + $0x2c4] ss:$8 sps:$4 sm:$0xff]  }
  0xcd   :  { %834 = vmatprep.subr.bf16.mxu0 %v2030_v39  ;;  %790 = vmatpush1.bf16.msra.mxu1 %v2103_v56  ;;  %v2122_v39 = vld [vmem:[#allocation13 + $0x2c0] ss:$8 sps:$4 sm:$0xff]  }
  0xce   :  { %791 = vmatprep.subr.bf16.mxu1 %v2107_v57 }
  0xd0   :  { %835 = vmatpush1.bf16.msra.mxu0 %v2032_v42  ;;  %v1443_v42 = vld [vmem:[#allocation10 + $0x4] sm:$0xf] }
  0xd1   :  { %836 = vmatprep.subr.bf16.mxu0 %v2033_v43  ;;  %792 = vmatpush1.bf16.msra.mxu1 %v2109_v60  ;;  %v2136_v43 = vld [vmem:[#allocation13 + $0x2e4] ss:$8 sps:$4 sm:$0xff]  }
  0xd2   :  { %793 = vmatprep.subr.bf16.mxu1 %v2113_v63 }
  0xd4   :  { %837 = vmatpush1.bf16.msra.mxu0 %v2035_v46  ;;  %v2139_v46 = vld [vmem:[#allocation13 + $0x2f0] ss:$8 sps:$4 sm:$0xff]  }
  0xd5   :  { %838 = vmatprep.subr.bf16.mxu0 %v2036_v47  ;;  %794 = vmatpush1.bf16.msra.mxu1 %v2115_v5  ;;  %v1720_v47 = vcombine.low %v2675_v1, %v2675_v1  ;;  %v259_v1 = vshrl.u32 %v258_v0, 7  ;;  %v256_v5 = vld [vmem:[%s3004_s7] sm:$0x3]  ;;  %s2974_s7 = sld [smem:[#allocation16]] }
  0xd6   :  { %795 = vmatprep.subr.bf16.mxu1 %v2119_v6 }
  0xd7   :  { %v264_v6 = vsub.s32 1, %v259_v1 }
  0xd8   :  { %839 = vmatpush1.bf16.msra.mxu0 %v2038_v50  ;;  %v1502_v50 = vld [vmem:[#allocation10 + $0x8] sm:$0xf] }
  0xd9   :  { %840 = vmatprep.subr.bf16.mxu0 %v2042_v51  ;;  %796 = vmatpush1.bf16.msra.mxu1 %v2121_v9  ;;  %v2146_v51 = vld [vmem:[#allocation14 + $0x10] sm:$0xff]  }
  0xda   :  { %797 = vmatprep.subr.bf16.mxu1 %v2125_v10  ;;  %v265_v10 = vrot.slane %v256_v5, %v264_v6 }
  0xdc   :  { %841 = vmatpush1.bf16.msra.mxu0 %v2044_v54  ;;  %v1561_v54 = vld [vmem:[#allocation10 + $0xc] sm:$0xf] }
  0xdd   :  { %851 = vmatprep.subr.bf16.mxu0 %v2052_v55  ;;  %798 = vmatpush1.bf16.msra.mxu1 %v2127_v12  ;;  %v1620_v55 = vld [vmem:[#allocation10 + $0x10] sm:$0xf] }
  0xde   :  { %799 = vmatprep.subr.bf16.mxu1 %v2131_v14 }
  0xdf   :  { %843 = vmatmul.mubr.bf16.vlgmr.msra.gmra.mrb[0].mxu0 %v1718_v58 }
  0xe0   :  { %852 = vmatpush1.bf16.msra.mxu0 %v2050_v59  ;;  %883 = vmatprep.mubr.bf16.mxu0 %v1721_v3  ;;  %v260_v3 = vsub.s32 0, %v259_v1 }
  0xe1   :  { %853 = vmatprep.subr.bf16.mxu0 %v2058_v62  ;;  %800 = vmatpush1.bf16.msra.mxu1 %v2133_v16 }
  0xe2   :  { %1911 = vmatprep.subr.bf16.mxu1 %v2493_v22  ;;  %v261_v9 = vrot.slane %v256_v5, %v260_v3 }
  0xe4   :  { %854 = vmatpush1.bf16.msra.mxu0 %v2056_v2  ;;  %802 = vmatmul.mubr.bf16.vlgmr.msra.gmra.mrb[0].mxu1 %v1716_v18 }
  0xe5   :  { %855 = vmatprep.subr.bf16.mxu0 %v2064_v4  ;;  %1912 = vmatpush3.bf16.msra.mxu1 %v2682_v20 }
  0xe6   :  { %1913 = vmatprep.subr.bf16.mxu1 %v2493_v22  ;;  %1919 = vmatprep.mubr.msk.bf16.mxu1 %vm2494_vm0, %v2493_v22 }
  0xe8   :  { %856 = vmatpush1.bf16.msra.mxu0 %v2062_v7 }
  0xe9   :  { %857 = vmatprep.subr.bf16.mxu0 %v2070_v8  ;;  %1914 = vmatpush3.bf16.msra.mxu1 %v2689_v24 }
  0xea   :  { %1915 = vmatprep.subr.bf16.mxu1 %v2493_v22 }
  0xec   :  { %858 = vmatpush1.bf16.msra.mxu0 %v2068_v11 }
  0xed   :  { %859 = vmatprep.subr.bf16.mxu0 %v2076_v13  ;;  %1916 = vmatpush3.bf16.msra.mxu1 %v2698_v27 }
  0xee   :  { %1917 = vmatprep.subr.bf16.mxu1 %v2493_v22 }
  0xf0   :  { %860 = vmatpush1.bf16.msra.mxu0 %v2074_v15 }
  0xf1   :  { %861 = vmatprep.subr.bf16.mxu0 %v2082_v17  ;;  %1918 = vmatpush3.bf16.msra.mxu1 %v2705_v30 }
  0xf2   :  { %1923 = vmatprep.subr.bf16.mxu1 %v2493_v22 }
  0xf4   :  { %862 = vmatpush1.bf16.msra.mxu0 %v2080_v19  ;;  %1920 = vmatmul.mubr.msk.bf16.vlgmr.msra.gmra.mrb[4].mxu1 %vm925_vm1, %v1349_v33 }
  0xf5   :  { %863 = vmatprep.subr.bf16.mxu0 %v2088_v21  ;;  %1924 = vmatpush3.bf16.msra.mxu1 %v2682_v20 }
  0xf6   :  { %1925 = vmatprep.subr.bf16.mxu1 %v2493_v22  ;;  %1931 = vmatprep.mubr.msk.bf16.mxu1 %vm2494_vm0, %v2493_v22 }
  0xf8   :  { %864 = vmatpush1.bf16.msra.mxu0 %v2086_v23 }
  0xf9   :  { %865 = vmatprep.subr.bf16.mxu0 %v2094_v25  ;;  %1926 = vmatpush3.bf16.msra.mxu1 %v2689_v24 }
  0xfa   :  { %1927 = vmatprep.subr.bf16.mxu1 %v2493_v22 }
  0xfc   :  { %866 = vmatpush1.bf16.msra.mxu0 %v2092_v26 }
  0xfd   :  { %867 = vmatprep.subr.bf16.mxu0 %v2100_v28  ;;  %1928 = vmatpush3.bf16.msra.mxu1 %v2698_v27 }
  0xfe   :  { %1929 = vmatprep.subr.bf16.mxu1 %v2493_v22 }
 0x100   :  { %868 = vmatpush1.bf16.msra.mxu0 %v2098_v29  ;;  %v2782_v29 = vld [vmem:[#allocation7] sm:$0xff]  }
 0x101   :  { %869 = vmatprep.subr.bf16.mxu0 %v2106_v31  ;;  %1930 = vmatpush3.bf16.msra.mxu1 %v2705_v30  ;;  %v988_v33 = vunpack.c.l.bf16 %v2782_v29 }
 0x102   :  { %1935 = vmatprep.subr.bf16.mxu1 %v2493_v22 }
 0x104   :  { %870 = vmatpush1.bf16.msra.mxu0 %v2104_v32  ;;  %1932 = vmatmul.mubr.msk.bf16.vlgmr.msra.gmra.mrb[8].mxu1 %vm925_vm1, %v1443_v42  ;;  %v2800_v42 = vld [vmem:[#allocation7 + $0x18] ss:$12 sps:$4 sm:$0xff]  }
 0x105   :  { %871 = vmatprep.subr.bf16.mxu0 %v2112_v34  ;;  %1936 = vmatpush3.bf16.msra.mxu1 %v2682_v20  ;;  %v2785_v34 = vld [vmem:[#allocation7 + $0x1c] sm:$0xff]   ;;  %v1154_v6 = vunpack.c.l.bf16 %v2800_v42 }
 0x106   :  { %1937 = vmatprep.subr.bf16.mxu1 %v2493_v22  ;;  %1943 = vmatprep.mubr.msk.bf16.mxu1 %vm2494_vm0, %v2493_v22 }
 0x108   :  { %872 = vmatpush1.bf16.msra.mxu0 %v2110_v35 }
 0x109   :  { %873 = vmatprep.subr.bf16.mxu0 %v2118_v36  ;;  %1938 = vmatpush3.bf16.msra.mxu1 %v2689_v24  ;;  %v1019_v36 = vunpack.c.h.bf16 %v2782_v29 }
 0x10a   :  { %1939 = vmatprep.subr.bf16.mxu1 %v2493_v22 }
 0x10c   :  { %874 = vmatpush1.bf16.msra.mxu0 %v2116_v37  ;;  %v1181_v37 = vunpack.c.l.bf16 %v2785_v34 }
 0x10d   :  { %875 = vmatprep.subr.bf16.mxu0 %v2124_v38  ;;  %1940 = vmatpush3.bf16.msra.mxu1 %v2698_v27 }
 0x10e   :  { %1941 = vmatprep.subr.bf16.mxu1 %v2493_v22 }
 0x110   :  { %876 = vmatpush1.bf16.msra.mxu0 %v2122_v39 }
 0x111   :  { %877 = vmatprep.subr.bf16.mxu0 %v2130_v40  ;;  %1942 = vmatpush3.bf16.msra.mxu1 %v2705_v30 }
 0x112   :  { %1947 = vmatprep.subr.bf16.mxu1 %v2493_v22 }
 0x114   :  { %878 = vmatpush1.bf16.msra.mxu0 %v2128_v41  ;;  %1944 = vmatmul.mubr.msk.bf16.vlgmr.msra.gmra.mrb[12].mxu1 %vm925_vm1, %v1502_v50  ;;  %v1208_v41 = vunpack.c.h.bf16 %v2785_v34 }
 0x115   :  { %879 = vmatprep.subr.bf16.mxu0 %v2136_v43  ;;  %1948 = vmatpush3.bf16.msra.mxu1 %v2682_v20 }
 0x116   :  { %1949 = vmatprep.subr.bf16.mxu1 %v2493_v22  ;;  %1955 = vmatprep.mubr.msk.bf16.mxu1 %vm2494_vm0, %v2493_v22 }
 0x118   :  { %880 = vmatpush1.bf16.msra.mxu0 %v2134_v44 }
 0x119   :  { %881 = vmatprep.subr.bf16.mxu0 %v2141_v45  ;;  %1950 = vmatpush3.bf16.msra.mxu1 %v2689_v24 }
 0x11a   :  { %1951 = vmatprep.subr.bf16.mxu1 %v2493_v22 }
 0x11c   :  { %882 = vmatpush1.bf16.msra.mxu0 %v2139_v46 }
 0x11d   :  { %1899 = vmatprep.subr.bf16.mxu0 %v2493_v22  ;;  %1952 = vmatpush3.bf16.msra.mxu1 %v2698_v27 }
 0x11e   :  { %1953 = vmatprep.subr.bf16.mxu1 %v2493_v22 }
 0x11f   :  { %884 = vmatmul.mubr.bf16.vlgmr.msra.gmra.mrb[0].mxu0 %v1720_v47 }
 0x120   :  { %1900 = vmatpush3.bf16.msra.mxu0 %v2144_v48  ;;  %1907 = vmatprep.mubr.msk.bf16.mxu0 %vm2494_vm0, %v2493_v22  ;;  %v1235_v48 = vunpack.c.h.bf16 %v2800_v42 }
 0x121   :  { %1901 = vmatprep.subr.bf16.mxu0 %v2493_v22  ;;  %1954 = vmatpush3.bf16.msra.mxu1 %v2705_v30 }
 0x122   :  { %1959 = vmatprep.subr.bf16.mxu1 %v2493_v22 }
 0x124   :  { %1902 = vmatpush3.bf16.msra.mxu0 %v2145_v49  ;;  %1956 = vmatmul.mubr.msk.bf16.vlgmr.msra.gmra.mrb[16].mxu1 %vm925_vm1, %v1561_v54 }
 0x125   :  { %1903 = vmatprep.subr.bf16.mxu0 %v2493_v22  ;;  %1960 = vmatpush3.bf16.msra.mxu1 %v2682_v20 }
 0x126   :  { %1967 = vmatprep.mubr.msk.bf16.mxu1 %vm2494_vm0, %v2493_v22  ;;  %1961 = vmatprep.subr.bf16.mxu1 %v2493_v22 }
 0x128   :  { %1904 = vmatpush3.bf16.msra.mxu0 %v2146_v51 }
 0x129   :  { %1905 = vmatprep.subr.bf16.mxu0 %v2493_v22  ;;  %1962 = vmatpush3.bf16.msra.mxu1 %v2689_v24 }
 0x12a   :  { %1963 = vmatprep.subr.bf16.mxu1 %v2493_v22 }
 0x12c   :  { %1906 = vmatpush3.bf16.msra.mxu0 %v2147_v52 }
 0x12d   :  { %1964 = vmatpush3.bf16.msra.mxu1 %v2698_v27 }
 0x12e   :  { %1965 = vmatprep.subr.bf16.mxu1 %v2493_v22 }
 0x12f   :  { %1908 = vmatmul.mubr.msk.bf16.vlgmr.msra.gmra.mrb[4].mxu0 %vm925_vm1, %v892_v53 }
 0x131   :  { %1966 = vmatpush3.bf16.msra.mxu1 %v2705_v30 }
 0x134   :  { %1968 = vmatmul.mubr.msk.bf16.vlgmr.msra.gmra.mrb[20].mxu1 %vm925_vm1, %v1620_v55  ;;  %v2816_v55 = vld [vmem:[#allocation7 + $0x8] sm:$0xff]  }
 0x1b7   :  { %v803_v56 = vpop.f32.mrb[0].mxu1 }
 0x1b8   :  { %v805_v57 = vpop.f32.mrb[1].mxu1  ;;  %v804_v11 = vadd.f32 %v803_v56, %v261_v9  ;;  %v1046_v56 = vunpack.c.l.bf16 %v2816_v55 }
 0x1b9   :  { %v807_v58 = vpop.f32.mrb[2].mxu1  ;;  %v806_v12 = vadd.f32 %v805_v57, %v265_v10  ;;  %v1429_v10 = vld [vmem:[#allocation11] sm:$0xff]  }
 0x1ba   :  { %v808_v59 = vpop.f32.mrb[3].mxu1  ;;  %v1073_v58 = vunpack.c.h.bf16 %v2816_v55 }
 0x1bb   :  { %v2823_v59 = vld [vmem:[#allocation7 + $0x10] sm:$0xff]  }
 0x1bc   :  { %v1127_v3 = vunpack.c.h.bf16 %v2823_v59 }
 0x1c7   :  { %v2763_v60 = vpop.f32.mrb[4].mxu1 }
 0x1c8   :  { %v1921_v61 = vpop.f32.mrb[5].mxu1 }
 0x1c9   :  { %v1426_v62 = vpop.f32.mrb[6].mxu1 }
 0x1ca   :  { %v1922_v63 = vpop.f32.mrb[7].mxu1 }
 0x1cb   :  { %v1100_v63 = vunpack.c.l.bf16 %v2823_v59 }
 0x1d7   :  { %v2765_v2 = vpop.f32.mrb[8].mxu1 }
 0x1d8   :  { %v1933_v4 = vpop.f32.mrb[9].mxu1 }
 0x1d9   :  { %v1484_v7 = vpop.f32.mrb[10].mxu1 }
 0x1da   :  { %v1934_v8 = vpop.f32.mrb[11].mxu1 }
 0x1e7   :  { %v2775_v19 = vpop.f32.mrb[12].mxu1 }
 0x1e8   :  { %v1945_v20 = vpop.f32.mrb[13].mxu1 }
 0x1e9   :  { %v1543_v21 = vpop.f32.mrb[14].mxu1 }
 0x1ea   :  { %v1946_v22 = vpop.f32.mrb[15].mxu1 }
 0x1f2   :  { %v885_v13 = vpop.f32.mrb[0].mxu0 }
 0x1f3   :  { %v1972_v14 = vadd.f32 %v885_v13, %v804_v11  ;;  %v887_v15 = vpop.f32.mrb[1].mxu0  ;;  %v1489_v13 = vunpack.c.h.bf16 %v1429_v10 }
 0x1f4   :  { %v2770_v16 = vadd.f32 %v887_v15, %v806_v12  ;;  %v889_v17 = vpop.f32.mrb[2].mxu0  ;;  %v1430_v12 = vunpack.c.l.bf16 %v1429_v10 }
 0x1f5   :  { %v890_v18 = vpop.f32.mrb[3].mxu0  ;;  %980 = vrot.lane.b32.xlu0 %v1972_v14, %s2483_s18 }
 0x1f6   :  { %1383 = vrot.lane.b32.xlu1 %v2770_v16, %s2483_s18  ;;  %v989_v35 = vmul.f32 %v2770_v16, %v988_v33  ;;  %v1020_v39 = vmul.f32 %v2770_v16, %v1019_v36  ;;  %v1182_v40 = vmul.f32 %v2770_v16, %v1181_v37  ;;  %v1209_v47 = vmul.f32 %v2770_v16, %v1208_v41 }
 0x1f7   :  { %v2780_v28 = vpop.f32.mrb[16].mxu1  ;;  %v1236_v52 = vmul.f32 %v2770_v16, %v1235_v48  ;;  %v1047_v57 = vmul.f32 %v2770_v16, %v1046_v56  ;;  %v1074_v62 = vmul.f32 %v2770_v16, %v1073_v58  ;;  %v1101_v1 = vmul.f32 %v2770_v16, %v1100_v63 }
 0x1f8   :  { %v1957_v30 = vpop.f32.mrb[17].mxu1  ;;  %v990_v38 = vsel %vm925_vm1, %v989_v35, 0.0  ;;  %v1021_v43 = vsel %vm925_vm1, %v1020_v39, 0.0  ;;  %v1183_v46 = vsel %vm925_vm1, %v1182_v40, 0.0  ;;  %v1210_v51 = vsel %vm925_vm1, %v1209_v47, 0.0  ;;  %v1260_v39 = vld [vmem:[#allocation8] sm:$0xff]  }
 0x1f9   :  { %v1602_v31 = vpop.f32.mrb[18].mxu1  ;;  %v1237_v53 = vsel %vm925_vm1, %v1236_v52, 0.0  ;;  %v1048_v61 = vsel %vm925_vm1, %v1047_v57, 0.0  ;;  %v1075_v0 = vsel %vm925_vm1, %v1074_v62, 0.0  ;;  %v1102_v4 = vsel %vm925_vm1, %v1101_v1, 0.0 }
 0x1fa   :  { %v1958_v32 = vpop.f32.mrb[19].mxu1  ;;  %v1128_v5 = vmul.f32 %v2770_v16, %v1127_v3  ;;  %v1155_v8 = vmul.f32 %v2770_v16, %v1154_v6  ;;  %v1276_v55 = vunpack.c.h.bf16 %v1260_v39 }
 0x1fc   :  { %v1129_v7 = vsel %vm925_vm1, %v1128_v5, 0.0  ;;  %v1156_v9 = vsel %vm925_vm1, %v1155_v8, 0.0 }
 0x202   :  { %v2777_v23 = vpop.f32.mrb[4].mxu0 }
 0x203   :  { %v969_v24 = vmul.f32 %v1972_v14, %v2777_v23  ;;  %v1909_v25 = vpop.f32.mrb[5].mxu0  ;;  %v1547_v14 = vld [vmem:[#allocation11 + $0x8] sm:$0xff]  }
 0x204   :  { %v966_v26 = vpop.f32.mrb[6].mxu0  ;;  %v1548_v22 = vunpack.c.l.bf16 %v1547_v14  ;;  %v1607_v31 = vunpack.c.h.bf16 %v1547_v14 }
 0x205   :  { %v1910_v27 = vpop.f32.mrb[7].mxu0  ;;  %v970_v54 = vsel %vm925_vm1, %v969_v24, 0.0 }
 0x207   :  { %v1658_v44 = vpop.f32.mrb[20].mxu1 }
 0x208   :  { %v1969_v45 = vpop.f32.mrb[21].mxu1 }
 0x209   :  { %v1661_v49 = vpop.f32.mrb[22].mxu1  ;;  %v1261_v45 = vunpack.c.l.bf16 %v1260_v39 }
 0x20a   :  { %v1970_v50 = vpop.f32.mrb[23].mxu1 }
 0x214   :  { %991 = vadd.xlane.f32.xlu0 %v990_v38 }
 0x218   :  { %1022 = vadd.xlane.f32.xlu0 %v1021_v43  ;;  %v1290_v43 = vld [vmem:[#allocation8 + $0x8] sm:$0xff]  }
 0x21a   :  { %1184 = vadd.xlane.f32.xlu1 %v1183_v46  ;;  %v1291_v46 = vunpack.c.l.bf16 %v1290_v43 }
 0x21e   :  { %1211 = vadd.xlane.f32.xlu1 %v1210_v51 }
 0x222   :  { %1238 = vadd.xlane.f32.xlu1 %v1237_v53 }
 0x226   :  { %971 = vadd.xlane.f32.xlu1 %v970_v54 }
 0x22e   :  { %994 = vrot.lane.b32.xlu0 %v2777_v23, %s2483_s18  ;;  %s2980_s18 = sld [smem:[#allocation16 + $0x2]] }
 0x24d   :  { %1049 = vadd.xlane.f32.xlu0 %v1048_v61 }
 0x251   :  { %1076 = vadd.xlane.f32.xlu0 %v1075_v0 }
 0x255   :  { %1103 = vadd.xlane.f32.xlu0 %v1102_v4 }
 0x259   :  { %1130 = vadd.xlane.f32.xlu0 %v1129_v7  ;;  %v1665_v7 = vld [vmem:[#allocation11 + $0x10] sm:$0xf] }
 0x25d   :  { %1157 = vadd.xlane.f32.xlu0 %v1156_v9 }
 0x267   :  { %v981_v11 = vpop.permute.xlu0 %980 }
 0x268   :  { %v983_v15 = vmul.f32 %v981_v11, %v2777_v23  ;;  %v1384_v17 = vpop.permute.xlu1 %1383 }
 0x269   :  { %v1424_v18 = vadd.f32 %v2763_v60, %v1384_v17  ;;  %v1482_v20 = vadd.f32 %v2765_v2, %v1384_v17  ;;  %v1541_v16 = vadd.f32 %v2775_v19, %v1384_v17  ;;  %v2850_v24 = vadd.f32 %v1658_v44, %v1384_v17 }
 0x26a   :  { %v984_v21 = vsel %vm925_vm1, %v983_v15, 0.0  ;;  %v1600_v60 = vadd.f32 %v2780_v28, %v1384_v17 }
 0x26b   :  { %985 = vadd.xlane.f32.xlu0 %v984_v21  ;;  %v1431_v25 = vmul.f32 %v1430_v12, %v1424_v18  ;;  %v1490_v26 = vmul.f32 %v1489_v13, %v1482_v20  ;;  %v1549_v23 = vmul.f32 %v1548_v22, %v1541_v16  ;;  %v1306_v18 = vunpack.c.h.bf16 %v1290_v43  ;;  %v1320_v20 = vld [vmem:[#allocation8 + $0x10] sm:$0xff]  }
 0x26c   :  { %v1608_v32 = vmul.f32 %v1607_v31, %v1600_v60  ;;  %v1321_v22 = vunpack.c.l.bf16 %v1320_v20 }
 0x26d   :  { %v1432_v27 = vsel %vm925_vm1, %v1431_v25, 0.0  ;;  %v1491_v30 = vsel %vm925_vm1, %v1490_v26, 0.0  ;;  %v1550_v2 = vsel %vm925_vm1, %v1549_v23, 0.0  ;;  %v1336_v26 = vunpack.c.h.bf16 %v1320_v20 }
 0x26e   :  { %1433 = vadd.xlane.f32.xlu1 %v1432_v27  ;;  %v1609_v19 = vsel %vm925_vm1, %v1608_v32, 0.0 }
 0x26f   :  { %1492 = vadd.xlane.f32.xlu0 %v1491_v30 }
 0x273   :  { %1551 = vadd.xlane.f32.xlu0 %v1550_v2 }
 0x277   :  { %1610 = vadd.xlane.f32.xlu0 %v1609_v19 }
 0x2a1   :  { %v992_v35 = vpop.xlane.xlu0 %991 }
 0x2a2   :  { %v1824_v38 = vmul.f32 -1.442695, %v992_v35 }
 0x2a4   :  { %2152 = vpow2.f32 %v1824_v38 }
 0x2a5   :  { %v1023_v40 = vpop.xlane.xlu0 %1022 }
 0x2a6   :  { %v1826_v44 = vmul.f32 -1.442695, %v1023_v40 }
 0x2a7   :  { %v1185_v2 = vpop.xlane.xlu1 %1184 }
 0x2a8   :  { %2154 = vpow2.f32 %v1826_v44  ;;  %v1838_v39 = vmul.f32 -1.442695, %v1185_v2 }
 0x2a9   :  { %v2857_v28 = vpop.permute.xlu0 %994 }
 0x2aa   :  { %v1262_v47 = vmul.f32 %v1261_v45, %v2857_v28  ;;  %v997_v49 = vmul.f32 %v2857_v28, %v988_v33  ;;  %v1292_v52 = vmul.f32 %v1291_v46, %v2857_v28  ;;  %v1024_v53 = vmul.f32 %v1019_v36, %v2857_v28 }
 0x2ab   :  { %v1186_v57 = vmul.f32 %v1181_v37, %v2857_v28  ;;  %v1051_v0 = vmul.f32 %v1046_v56, %v2857_v28  ;;  %v1213_v1 = vmul.f32 %v1208_v41, %v2857_v28  ;;  %v1078_v5 = vmul.f32 %v1073_v58, %v2857_v28  ;;  %v1212_v19 = vpop.xlane.xlu1 %1211 }
 0x2ac   :  { %v1263_v50 = vsel %vm925_vm1, %v1262_v47, 0.0  ;;  %v998_v51 = vsel %vm925_vm1, %v997_v49, 0.0  ;;  %v1293_v33 = vsel %vm925_vm1, %v1292_v52, 0.0  ;;  %v1025_v62 = vsel %vm925_vm1, %v1024_v53, 0.0 }
 0x2ad   :  { %1264 = vadd.xlane.f32.xlu0 %v1263_v50  ;;  %999 = vadd.xlane.f32.xlu1 %v998_v51  ;;  %v1187_v37 = vsel %vm925_vm1, %v1186_v57, 0.0  ;;  %v1052_v4 = vsel %vm925_vm1, %v1051_v0, 0.0  ;;  %v1666_v56 = vunpack.c.l.bf16 %v1665_v7  ;;  %v1214_v8 = vsel %vm925_vm1, %v1213_v1, 0.0 }
 0x2ae   :  { %v2153_v54 = vpop.eup %2152  ;;  %v1079_v9 = vsel %vm925_vm1, %v1078_v5, 0.0  ;;  %v1240_v34 = vmul.f32 %v1235_v48, %v2857_v28  ;;  %v1105_v41 = vmul.f32 %v1100_v63, %v2857_v28  ;;  %v1132_v12 = vmul.f32 %v1127_v3, %v2857_v28 }
 0x2af   :  { %v1005_v61 = vadd.f32 1.0, %v2153_v54  ;;  %v1667_v11 = vmul.f32 %v1666_v56, %v2850_v24  ;;  %v1277_v17 = vmul.f32 %v1276_v55, %v2857_v28  ;;  %v1159_v3 = vmul.f32 %v1154_v6, %v2857_v28  ;;  %v1239_v38 = vpop.xlane.xlu1 %1238 }
 0x2b0   :  { %v1241_v58 = vsel %vm925_vm1, %v1240_v34, 0.0  ;;  %v1106_v10 = vsel %vm925_vm1, %v1105_v41, 0.0  ;;  %v1133_v15 = vsel %vm925_vm1, %v1132_v12, 0.0  ;;  %v1307_v16 = vmul.f32 %v1306_v18, %v2857_v28 }
 0x2b1   :  { %1294 = vadd.xlane.f32.xlu0 %v1293_v33  ;;  %1026 = vadd.xlane.f32.xlu1 %v1025_v62  ;;  %2156 = vrcp.f32 %v1005_v61  ;;  %v1668_v14 = vsel %vm925_vm1, %v1667_v11, 0.0  ;;  %v1278_v59 = vsel %vm925_vm1, %v1277_v17, 0.0  ;;  %v1160_v21 = vsel %vm925_vm1, %v1159_v3, 0.0 }
 0x2b2   :  { %v2155_v29 = vpop.eup %2154  ;;  %v1308_v24 = vsel %vm925_vm1, %v1307_v16, 0.0  ;;  %v1322_v25 = vmul.f32 %v1321_v22, %v2857_v28  ;;  %v1337_v42 = vmul.f32 %v1336_v26, %v2857_v28  ;;  %v1840_v40 = vmul.f32 -1.442695, %v1212_v19 }
 0x2b3   :  { %v1032_v36 = vadd.f32 1.0, %v2155_v29  ;;  %v1842_v44 = vmul.f32 -1.442695, %v1239_v38  ;;  %v972_v45 = vpop.xlane.xlu1 %971 }
 0x2b4   :  { %v1323_v27 = vsel %vm925_vm1, %v1322_v25, 0.0  ;;  %v1338_v6 = vsel %vm925_vm1, %v1337_v42, 0.0  ;;  %v1823_v46 = vmul.f32 -1.442695, %v972_v45 }
 0x2b5   :  { %2158 = vrcp.f32 %v1032_v36  ;;  %1188 = vadd.xlane.f32.xlu0 %v1187_v37  ;;  %1053 = vadd.xlane.f32.xlu1 %v1052_v4 }
 0x2b6   :  { %2160 = vpow2.f32 %v1838_v39 }
 0x2b7   :  { %2162 = vpow2.f32 %v1840_v40 }
 0x2b8   :  { %2164 = vpow2.f32 %v1842_v44 }
 0x2b9   :  { %1215 = vadd.xlane.f32.xlu0 %v1214_v8  ;;  %1080 = vadd.xlane.f32.xlu1 %v1079_v9  ;;  %2166 = vpow2.f32 %v1823_v46 }
 0x2bb   :  { %v2899_v48 = vpop.eup %2156 }
 0x2bd   :  { %1242 = vadd.xlane.f32.xlu0 %v1241_v58  ;;  %1107 = vadd.xlane.f32.xlu1 %v1106_v10 }
 0x2bf   :  { %v2901_v13 = vpop.eup %2158 }
 0x2c0   :  { %v2905_v63 = vadd.f32 %v2901_v13, %v2899_v48  ;;  %v2161_v57 = vpop.eup %2160 }
 0x2c1   :  { %1669 = vadd.xlane.f32.xlu0 %v1668_v14  ;;  %1134 = vadd.xlane.f32.xlu1 %v1133_v15  ;;  %v2163_v61 = vpop.eup %2162  ;;  %v1194_v62 = vadd.f32 1.0, %v2161_v57 }
 0x2c2   :  { %v2165_v33 = vpop.eup %2164  ;;  %v1221_v36 = vadd.f32 1.0, %v2163_v61 }
 0x2c3   :  { %v1248_v37 = vadd.f32 1.0, %v2165_v33  ;;  %v2167_v5 = vpop.eup %2166 }
 0x2c4   :  { %v976_v58 = vadd.f32 1.0, %v2167_v5 }
 0x2c5   :  { %1279 = vadd.xlane.f32.xlu1 %v1278_v59 }
 0x2c9   :  { %1161 = vadd.xlane.f32.xlu1 %v1160_v21 }
 0x2cd   :  { %1309 = vadd.xlane.f32.xlu1 %v1308_v24 }
 0x2d1   :  { %1324 = vadd.xlane.f32.xlu1 %v1323_v27 }
 0x2d5   :  { %1339 = vadd.xlane.f32.xlu1 %v1338_v6 }
 0x2da   :  { %v1050_v30 = vpop.xlane.xlu0 %1049 }
 0x2db   :  { %v1828_v47 = vmul.f32 -1.442695, %v1050_v30 }
 0x2dd   :  { %2168 = vpow2.f32 %v1828_v47 }
 0x2de   :  { %v1077_v23 = vpop.xlane.xlu0 %1076 }
 0x2df   :  { %v1830_v49 = vmul.f32 -1.442695, %v1077_v23 }
 0x2e1   :  { %2170 = vpow2.f32 %v1830_v49 }
 0x2e2   :  { %v1104_v60 = vpop.xlane.xlu0 %1103 }
 0x2e3   :  { %v1832_v50 = vmul.f32 -1.442695, %v1104_v60 }
 0x2e5   :  { %2172 = vpow2.f32 %v1832_v50 }
 0x2e6   :  { %v1131_v31 = vpop.xlane.xlu0 %1130 }
 0x2e7   :  { %v1834_v51 = vmul.f32 -1.442695, %v1131_v31  ;;  %v2169_v9 = vpop.eup %2168 }
 0x2e8   :  { %v1059_v12 = vadd.f32 1.0, %v2169_v9 }
 0x2e9   :  { %2174 = vpow2.f32 %v1834_v51 }
 0x2ea   :  { %v1158_v32 = vpop.xlane.xlu0 %1157 }
 0x2eb   :  { %v1836_v52 = vmul.f32 -1.442695, %v1158_v32  ;;  %v2171_v55 = vpop.eup %2170 }
 0x2ec   :  { %v1086_v17 = vadd.f32 1.0, %v2171_v55 }
 0x2ed   :  { %2176 = vpow2.f32 %v1836_v52 }
 0x2ee   :  { %2178 = vrcp.f32 %v1194_v62 }
 0x2ef   :  { %2180 = vrcp.f32 %v1221_v36  ;;  %v2173_v11 = vpop.eup %2172 }
 0x2f0   :  { %v1113_v20 = vadd.f32 1.0, %v2173_v11 }
 0x2f3   :  { %v2175_v15 = vpop.eup %2174 }
 0x2f4   :  { %v1140_v16 = vadd.f32 1.0, %v2175_v15 }
 0x2f7   :  { %v2177_v3 = vpop.eup %2176 }
 0x2f8   :  { %v2921_v35 = vpop.xlane.xlu0 %985  ;;  %v1167_v24 = vadd.f32 1.0, %v2177_v3  ;;  %v2927_v26 = vpop.eup %2178 }
 0x2f9   :  { %v2930_v6 = vpop.eup %2180 }
 0x2fb   :  { %v1434_v53 = vpop.xlane.xlu1 %1433 }
 0x2fc   :  { %v1493_v43 = vpop.xlane.xlu0 %1492  ;;  %v1855_v7 = vmul.f32 -1.442695, %v1434_v53 }
 0x2fd   :  { %v1857_v34 = vmul.f32 -1.442695, %v1493_v43 }
 0x300   :  { %v1552_v28 = vpop.xlane.xlu0 %1551 }
 0x301   :  { %v1859_v18 = vmul.f32 -1.442695, %v1552_v28 }
 0x304   :  { %v1611_v54 = vpop.xlane.xlu0 %1610 }
 0x305   :  { %v1861_v27 = vmul.f32 -1.442695, %v1611_v54 }
 0x33a   :  { %v1265_v0 = vpop.xlane.xlu0 %1264  ;;  %v1000_v29 = vpop.xlane.xlu1 %999 }
 0x33b   :  { %v1001_v1 = vadd.f32 %v1000_v29, %v2921_v35  ;;  %v1266_v42 = vadd.f32 %v1265_v0, %v2921_v35 }
 0x33d   :  { %v1825_v4 = vmul.f32 -1.442695, %v1001_v1  ;;  %v1844_v40 = vmul.f32 -1.442695, %v1266_v42 }
 0x33e   :  { %v1295_v56 = vpop.xlane.xlu0 %1294  ;;  %v1027_v8 = vpop.xlane.xlu1 %1026 }
 0x33f   :  { %v1028_v41 = vadd.f32 %v1027_v8, %v2921_v35  ;;  %2182 = vpow2.f32 %v1825_v4  ;;  %v1296_v44 = vadd.f32 %v1295_v56, %v2921_v35 }
 0x340   :  { %2184 = vrcp.f32 %v1248_v37 }
 0x341   :  { %v1827_v10 = vmul.f32 -1.442695, %v1028_v41  ;;  %2186 = vpow2.f32 %v1855_v7  ;;  %v1846_v33 = vmul.f32 -1.442695, %v1296_v44 }
 0x342   :  { %v1054_v14 = vpop.xlane.xlu1 %1053  ;;  %2188 = vpow2.f32 %v1857_v34  ;;  %v1189_v59 = vpop.xlane.xlu0 %1188 }
 0x343   :  { %2190 = vpow2.f32 %v1827_v10  ;;  %v1055_v21 = vadd.f32 %v1054_v14, %v2921_v35  ;;  %v1190_v57 = vadd.f32 %v1189_v59, %v2921_v35 }
 0x344   :  { %2192 = vrcp.f32 %v976_v58 }
 0x345   :  { %2194 = vrcp.f32 %v1059_v12  ;;  %v1829_v30 = vmul.f32 -1.442695, %v1055_v21  ;;  %v1839_v7 = vmul.f32 -1.442695, %v1190_v57 }
 0x346   :  { %v1081_v22 = vpop.xlane.xlu1 %1080  ;;  %2196 = vrcp.f32 %v1086_v17  ;;  %v1216_v23 = vpop.xlane.xlu0 %1215 }
 0x347   :  { %v1082_v25 = vadd.f32 %v1081_v22, %v2921_v35  ;;  %2198 = vpow2.f32 %v1859_v18  ;;  %v1217_v0 = vadd.f32 %v1216_v23, %v2921_v35 }
 0x348   :  { %2200 = vrcp.f32 %v1113_v20 }
 0x349   :  { %v2183_v60 = vpop.eup %2182  ;;  %2202 = vrcp.f32 %v1140_v16  ;;  %v1831_v19 = vmul.f32 -1.442695, %v1082_v25  ;;  %v1841_v55 = vmul.f32 -1.442695, %v1217_v0 }
 0x34a   :  { %v1108_v31 = vpop.xlane.xlu1 %1107  ;;  %v2932_v2 = vpop.eup %2184  ;;  %2204 = vrcp.f32 %v1167_v24  ;;  %v1012_v32 = vadd.f32 1.0, %v2183_v60 }
 0x34b   :  { %v1109_v38 = vadd.f32 %v1108_v31, %v2921_v35  ;;  %v2187_v39 = vpop.eup %2186  ;;  %2206 = vpow2.f32 %v1861_v27  ;;  %v1243_v51 = vpop.xlane.xlu0 %1242 }
 0x34c   :  { %v2189_v43 = vpop.eup %2188  ;;  %2208 = vpow2.f32 %v1829_v30  ;;  %v1438_v49 = vadd.f32 1.0, %v2187_v39  ;;  %v1244_v37 = vadd.f32 %v1243_v51, %v2921_v35 }
 0x34d   :  { %v2191_v45 = vpop.eup %2190  ;;  %2210 = vrcp.f32 %v1012_v32  ;;  %v1833_v46 = vmul.f32 -1.442695, %v1109_v38  ;;  %v1497_v54 = vadd.f32 1.0, %v2189_v43 }
 0x34e   :  { %v1135_v28 = vpop.xlane.xlu1 %1134  ;;  %v2936_v47 = vpop.eup %2192  ;;  %v1039_v50 = vadd.f32 1.0, %v2191_v45  ;;  %2212 = vpow2.f32 %v1831_v19  ;;  %v1843_v11 = vmul.f32 -1.442695, %v1244_v37 }
 0x34f   :  { %v1136_v52 = vadd.f32 %v1135_v28, %v2921_v35  ;;  %v2939_v53 = vpop.eup %2194  ;;  %2214 = vpow2.f32 %v1844_v40  ;;  %v1670_v9 = vpop.xlane.xlu0 %1669 }
 0x350   :  { %v2942_v61 = vpop.eup %2196  ;;  %2216 = vrcp.f32 %v1039_v50  ;;  %v1863_v15 = vmul.f32 -1.442695, %v1670_v9 }
 0x351   :  { %v2199_v62 = vpop.eup %2198  ;;  %2218 = vpow2.f32 %v1833_v46  ;;  %v1835_v29 = vmul.f32 -1.442695, %v1136_v52 }
 0x352   :  { %v1280_v36 = vpop.xlane.xlu1 %1279  ;;  %v2945_v1 = vpop.eup %2200  ;;  %2220 = vrcp.f32 %v1438_v49  ;;  %v1556_v8 = vadd.f32 1.0, %v2199_v62 }
 0x353   :  { %v1281_v4 = vadd.f32 %v1280_v36, %v2921_v35  ;;  %v2949_v5 = vpop.eup %2202  ;;  %2222 = vrcp.f32 %v1497_v54 }
 0x354   :  { %v2951_v56 = vpop.eup %2204  ;;  %2224 = vpow2.f32 %v1846_v33 }
 0x355   :  { %v1845_v34 = vmul.f32 -1.442695, %v1281_v4  ;;  %v2207_v41 = vpop.eup %2206  ;;  %2226 = vpow2.f32 %v1835_v29 }
 0x356   :  { %v1162_v58 = vpop.xlane.xlu1 %1161  ;;  %v2209_v10 = vpop.eup %2208  ;;  %v1615_v16 = vadd.f32 1.0, %v2207_v41 }
 0x357   :  { %2228 = vpow2.f32 %v1845_v34  ;;  %v1163_v12 = vadd.f32 %v1162_v58, %v2921_v35  ;;  %v2211_v14 = vpop.eup %2210  ;;  %v1066_v18 = vadd.f32 1.0, %v2209_v10 }
 0x358   :  { %2230 = vpow2.f32 %v1839_v7  ;;  %v2213_v17 = vpop.eup %2212  ;;  %v1015_v25 = vmul.f32 %v2211_v14, %v2899_v48 }
 0x359   :  { %2232 = vrcp.f32 %v1556_v8  ;;  %v1837_v59 = vmul.f32 -1.442695, %v1163_v12  ;;  %v2215_v3 = vpop.eup %2214  ;;  %v1093_v42 = vadd.f32 1.0, %v2213_v17 }
 0x35a   :  { %2234 = vpow2.f32 %v1841_v55  ;;  %v1310_v20 = vpop.xlane.xlu1 %1309  ;;  %v2217_v21 = vpop.eup %2216  ;;  %v1270_v39 = vadd.f32 1.0, %v2215_v3 }
 0x35b   :  { %2236 = vpow2.f32 %v1843_v11  ;;  %v1311_v22 = vadd.f32 %v1310_v20, %v2921_v35  ;;  %v2219_v24 = vpop.eup %2218  ;;  %v1042_v27 = vmul.f32 %v2217_v21, %v2901_v13  ;;  %v1062_v13 = vadd.f32 %v2939_v53, %v2905_v63 }
 0x35c   :  { %2238 = vpow2.f32 %v1863_v15  ;;  %v2957_v30 = vpop.eup %2220  ;;  %v1120_v32 = vadd.f32 1.0, %v2219_v24 }
 0x35d   :  { %2240 = vpow2.f32 %v1837_v59  ;;  %v1847_v23 = vmul.f32 -1.442695, %v1311_v22  ;;  %v2959_v60 = vpop.eup %2222  ;;  %v1043_v31 = vadd.f32 %v1042_v27, %v1015_v25  ;;  %v1089_v28 = vadd.f32 %v2942_v61, %v1062_v13 }
 0x35e   :  { %2242 = vrcp.f32 %v1066_v18  ;;  %v1325_v19 = vpop.xlane.xlu1 %1324  ;;  %v2225_v38 = vpop.eup %2224  ;;  %v1683_v13 = vstv %s2974_s7 }
 0x35f   :  { %2244 = vrcp.f32 %v1615_v16  ;;  %v1326_v40 = vadd.f32 %v1325_v19, %v2921_v35  ;;  %v2227_v48 = vpop.eup %2226  ;;  %v1300_v49 = vadd.f32 1.0, %v2225_v38  ;;  %v1116_v57 = vadd.f32 %v2945_v1, %v1089_v28 }
 0x360   :  { %2246 = vrcp.f32 %v1093_v42  ;;  %v1147_v44 = vadd.f32 1.0, %v2227_v48 }
 0x361   :  { %v2229_v43 = vpop.eup %2228  ;;  %2248 = vpow2.f32 %v1847_v23  ;;  %v1848_v45 = vmul.f32 -1.442695, %v1326_v40  ;;  %v1143_v36 = vadd.f32 %v2949_v5, %v1116_v57 }
 0x362   :  { %v2231_v46 = vpop.eup %2230  ;;  %2250 = vrcp.f32 %v1120_v32  ;;  %v1340_v50 = vpop.xlane.xlu1 %1339  ;;  %v1285_v63 = vadd.f32 1.0, %v2229_v43 }
 0x363   :  { %v2965_v51 = vpop.eup %2232  ;;  %2252 = vrcp.f32 %v1270_v39  ;;  %v1341_v52 = vadd.f32 %v1340_v50, %v2921_v35  ;;  %v1201_v62 = vadd.f32 1.0, %v2231_v46  ;;  %v1170_v8 = vadd.f32 %v2951_v56, %v1143_v36 }
 0x364   :  { %v2235_v54 = vpop.eup %2234  ;;  %2254 = vrcp.f32 %v1147_v44 }
 0x365   :  { %v2237_v33 = vpop.eup %2236  ;;  %2256 = vpow2.f32 %v1848_v45  ;;  %v1849_v0 = vmul.f32 -1.442695, %v1341_v52  ;;  %v1228_v4 = vadd.f32 1.0, %v2235_v54  ;;  %v1197_v12 = vadd.f32 %v2927_v26, %v1170_v8 }
 0x366   :  { %v2239_v29 = vpop.eup %2238  ;;  %2258 = vrcp.f32 %v1300_v49  ;;  %v1255_v35 = vadd.f32 1.0, %v2237_v33 }
 0x367   :  { %v2241_v37 = vpop.eup %2240  ;;  %2260 = vpow2.f32 %v1849_v0  ;;  %v1674_v41 = vadd.f32 1.0, %v2239_v29 }
 0x368   :  { %v2243_v7 = vpop.eup %2242  ;;  %2262 = vrcp.f32 %v1285_v63  ;;  %v1174_v9 = vadd.f32 1.0, %v2241_v37 }
 0x369   :  { %v2245_v34 = vpop.eup %2244  ;;  %2264 = vrcp.f32 %v1201_v62  ;;  %v1069_v10 = vmul.f32 %v2243_v7, %v2939_v53  ;;  %v1224_v53 = vadd.f32 %v2930_v6, %v1197_v12  ;;  %v1690_v7 = vstv %s1864_s23 }
 0x36a   :  { %v2247_v55 = vpop.eup %2246  ;;  %2266 = vrcp.f32 %v1174_v9 }
 0x36b   :  { %v2249_v58 = vpop.eup %2248  ;;  %2268 = vrcp.f32 %v1228_v4  ;;  %v1096_v17 = vmul.f32 %v2247_v55, %v2942_v61  ;;  %v1070_v18 = vadd.f32 %v1069_v10, %v1043_v31  ;;  %v1251_v19 = vadd.f32 %v2932_v2, %v1224_v53 }
 0x36c   :  { %v2251_v11 = vpop.eup %2250  ;;  %2270 = vrcp.f32 %v1255_v35  ;;  %v1315_v14 = vadd.f32 1.0, %v2249_v58  ;;  %v1500_v31 = vadd.f32 %v2959_v60, %v2957_v30  ;;  %v1701_v55 = vstv %s1867_s26 }
 0x36d   :  { %v2253_v15 = vpop.eup %2252  ;;  %2272 = vrcp.f32 %v1674_v41  ;;  %v1123_v20 = vmul.f32 %v2251_v11, %v2945_v1  ;;  %v1097_v24 = vadd.f32 %v1096_v17, %v1070_v18  ;;  %v1693_v28 = vadd.f32 %v2936_v47, %v1251_v19 }
 0x36e   :  { %v2255_v59 = vpop.eup %2254  ;;  %2274 = vrcp.f32 %v1315_v14  ;;  %v1559_v43 = vadd.f32 %v2965_v51, %v1500_v31  ;;  %v1684_v52 = vmul.f32 %v1683_v13, %v1251_v19 }
 0x36f   :  { %v2257_v3 = vpop.eup %2256  ;;  %v1150_v25 = vmul.f32 %v2255_v59, %v2949_v5  ;;  %v1124_v23 = vadd.f32 %v1123_v20, %v1097_v24  ;;  %v1868_v33 = vadd.f32 -1.0, %v1693_v28 }
 0x370   :  { %v2259_v21 = vpop.eup %2258  ;;  %v1330_v16 = vadd.f32 1.0, %v2257_v3  ;;  %v1618_v49 = vadd.f32 %v2245_v34, %v1559_v43 }
 0x371   :  { %v2261_v22 = vpop.eup %2260  ;;  %v1151_v38 = vadd.f32 %v1150_v25, %v1124_v23  ;;  %v1695_v8 = vand.u32 2147483647, %v1868_v33 }
 0x372   :  { %v2263_v27 = vpop.eup %2262  ;;  %2276 = vrcp.f32 %v1330_v16  ;;  %v1345_v61 = vadd.f32 1.0, %v2261_v22 }
 0x373   :  { %v2265_v42 = vpop.eup %2264  ;;  %v1288_v39 = vadd.f32 %v2263_v27, %v2253_v15 }
 0x374   :  { %v2267_v32 = vpop.eup %2266  ;;  %2278 = vrcp.f32 %v1345_v61  ;;  %v1204_v44 = vmul.f32 %v2265_v42, %v2927_v26  ;;  %v1687_v26 = vstv %s2980_s18 }
 0x375   :  { %v2269_v1 = vpop.eup %2268  ;;  %v1177_v5 = vmul.f32 %v2267_v32, %v2951_v56  ;;  %v1303_v50 = vadd.f32 %v2259_v21, %v1288_v39 }
 0x376   :  { %v2271_v40 = vpop.eup %2270  ;;  %v1231_v30 = vmul.f32 %v2269_v1, %v2930_v6  ;;  %v1685_v6 = vsub.f32 %v2936_v47, %v1684_v52 }
 0x377   :  { %v2273_v48 = vpop.eup %2272  ;;  %v1178_v45 = vadd.f32 %v1177_v5, %v1151_v38  ;;  %v1258_v56 = vmul.f32 %v2271_v40, %v2932_v2  ;;  %v1696_v2 = vstv %s1866_s25 }
 0x378   :  { %v2275_v46 = vpop.eup %2274  ;;  %v1677_v54 = vadd.f32 %v2273_v48, %v1618_v49  ;;  %v1686_v34 = vsub.f32 0.0, %v1685_v6  ;;  %v1697_v58 = vmul.f32 %v1696_v2, %v1695_v8 }
 0x379   :  { %v1205_v60 = vadd.f32 %v1204_v44, %v1178_v45  ;;  %v1318_v51 = vadd.f32 %v2275_v46, %v1303_v50 }
 0x37a   :  { %v1688_v36 = vmul.f32 %v1687_v26, %v1677_v54 }
 0x37b   :  { %v1232_v57 = vadd.f32 %v1231_v30, %v1205_v60 }
 0x37c   :  { %v2277_v63 = vpop.eup %2276 }
 0x37d   :  { %v1259_v62 = vadd.f32 %v1258_v56, %v1232_v57  ;;  %v1333_v0 = vadd.f32 %v2277_v63, %v1318_v51 }
 0x37e   :  { %v2279_v29 = vpop.eup %2278 }
 0x37f   :  { %v1699_v37 = vsub.f32 %v2936_v47, %v1259_v62  ;;  %v1348_v4 = vadd.f32 %v2279_v29, %v1333_v0 }
 0x381   :  { %v1689_v35 = vsub.f32 %v1348_v4, %v1688_v36  ;;  %v1700_v9 = vand.u32 2147483647, %v1699_v37 }
 0x383   :  { %v1691_v41 = vmul.f32 %v1690_v7, %v1689_v35  ;;  %v1702_v11 = vmul.f32 %v1701_v55, %v1700_v9 }
 0x385   :  { %v1692_v10 = vsub.f32 %v1686_v34, %v1691_v41 }
 0x387   :  { %v1698_v12 = vadd.f32 %v1697_v58, %v1692_v10 }
 0x389   :  { %v1703_v14 = vadd.f32 %v1702_v11, %v1698_v12 }
 0x38b   :  { %1705 = vst.msk [vmem:[%s3008_s11] sm:$0xff] %vm1704_vm2, %v1703_v14 }
 0x38c   :  { %1710 = vsyncpa [#allocation3], 1 }
 0x38d   :  { %1711 = vsyncpa [#allocation6], 1 }
 0x38e   :  { %1712 = vsyncpa [#allocation9], 1 }
 0x38f   :  { %1713 = vsyncpa [#allocation12], 1 }
 0x390   :  { %1714 = vsyncpa [#allocation15], 1 }
 0x391   :  { %1715 = vsyncpa [#allocation4], 1 }

</bundles_post_ra>
